<compile_context>
chip_gen: v6e
topology: v6e:2x2x1
jax: 0.10.0
libtpu: 0.0.40
codegen_flags: <defaults>
</compile_context>

<pallas_src>
import functools

import jax
import jax.numpy as jnp
from jax.experimental import pallas as pl
from jax.experimental.pallas import tpu as pltpu

DIM_IN = 1500     # input features
DIM_MASK = 500    # li_mask out_features == width of s1 / s2 / mask
DIM2 = 10         # fc1 hidden width (module default dim2=10, dim3=None)
DIM_OUT = 1       # score

LANE = 128


def _round_up(n, m):
    return (n + m - 1) // m * m


DIM_MASK_P = _round_up(DIM_MASK, LANE)  # 512
DIM_IN_P = 3 * DIM_MASK_P               # 1536 (s1|pad, s2|pad, ref|pad)
DIM2_P = _round_up(DIM2, LANE)          # 128
DIM_CAT_P = 2 * DIM_MASK_P              # 1024


def _masked_rank2_kernel(x_ref, wm_ref, bm_ref, w1_ref, b1_ref,
                         w2_ref, b2_ref, o_ref):
    """Whole forward pass for one batch tile, resident in VMEM.

    x_ref lanes are pre-packed as [s1(500)+pad | s2(500)+pad | ref(500)+pad],
    and wm_ref rows are remapped to match, so the mask projection is exact.
    """
    x = x_ref[...]                                             # (TB, 1536) bf16

    # Mask projection: li_mask(full input).  bf16 operands, f32 accumulation.
    proj = jnp.dot(x, wm_ref[...],
                   preferred_element_type=jnp.float32) + bm_ref[...]

    # Softmax over the (padded) 500-dim.  Padded output columns carry a -1e30
    # bias (and zero weight rows / zero x lanes) so they contribute exactly 0.
    m = jnp.max(proj, axis=-1, keepdims=True)
    e = jnp.exp(proj - m)
    inv = pl.reciprocal(jnp.sum(e, axis=-1, keepdims=True), approx=True)
    mask = (e * inv).astype(jnp.bfloat16)                      # (TB, 512) bf16

    # s1 / s2 are static, lane-aligned views of the packed input block.
    s1 = x[:, :DIM_MASK_P]                                     # (TB, 512) bf16
    s2 = x[:, DIM_MASK_P:DIM_CAT_P]                            # (TB, 512) bf16

    # fc1 + Tanh as two MXU dots (no (TB,1024) concat materialization).
    # Dropout is identity in inference mode.
    h = (jnp.dot(mask * s1, w1_ref[:DIM_MASK_P, :],
                 preferred_element_type=jnp.float32)
         + jnp.dot(mask * s2, w1_ref[DIM_MASK_P:, :],
                   preferred_element_type=jnp.float32)
         + b1_ref[...])
    h = jnp.tanh(h)                                            # (TB, 128) f32

    # fc2: tiny (128 -> 1) projection as a VPU multiply + lane reduce
    # instead of a degenerate N=1 MXU matmul.
    out = jnp.sum(h * w2_ref[...], axis=-1, keepdims=True) + b2_ref[...]
    o_ref[...] = out.astype(o_ref.dtype)


@functools.partial(jax.jit, static_argnames=("tile_b",))
def masked_model_rank2(x, wm, bm, w1, b1, w2, b2, *, tile_b=512):
    """x: (B, 1500); wm: (1500, 500); bm: (500,); w1: (1000, dim2);
    b1: (dim2,); w2: (dim2, 1); b2: (1,).  Weights stored as (in, out)."""
    B = x.shape[0]
    assert x.shape[1] == DIM_IN
    assert tile_b > 0 and tile_b % 16 == 0  # bf16 packs 16 rows per vreg

    f32, bf16 = jnp.float32, jnp.bfloat16

    # --- batch tiling: big tiles to amortize ~0.35us/step grid overhead, but
    #     make sure there are >=2 grid steps when B allows it so v7x's second
    #     TensorCore has work to shard ("parallel" axis). ------------------
    b16 = _round_up(B, 16)
    tile = min(tile_b, b16)
    if b16 // tile < 2 and tile > 16:
        tile = _round_up(b16 // 2, 16)
    b_pad = _round_up(B, tile)

    # --- repack x directly in bf16: [s1|pad12 | s2|pad12 | ref|pad12] ------
    xb = x.astype(bf16)
    zcol = jnp.zeros((B, DIM_MASK_P - DIM_MASK), bf16)
    xp = jnp.concatenate(
        [xb[:, :DIM_MASK], zcol,
         xb[:, DIM_MASK:2 * DIM_MASK], zcol,
         xb[:, 2 * DIM_MASK:], zcol], axis=-1)                 # (B, 1536) bf16
    xp = jnp.pad(xp, ((0, b_pad - B), (0, 0)))

    # li_mask weight rows remapped to the packed x layout; padded rows are
    # zero and padded x lanes are zero, so the projection stays exact.
    wmb = wm.astype(bf16)
    wmp = jnp.zeros((DIM_IN_P, DIM_MASK_P), bf16)
    wmp = wmp.at[:DIM_MASK, :DIM_MASK].set(wmb[:DIM_MASK])
    wmp = wmp.at[DIM_MASK_P:DIM_MASK_P + DIM_MASK, :DIM_MASK].set(
        wmb[DIM_MASK:2 * DIM_MASK])
    wmp = wmp.at[2 * DIM_MASK_P:2 * DIM_MASK_P + DIM_MASK, :DIM_MASK].set(
        wmb[2 * DIM_MASK:])
    # Padded softmax columns get a -1e30 bias so they contribute exactly 0.
    bmp = jnp.pad(bm.astype(f32), (0, DIM_MASK_P - DIM_MASK),
                  constant_values=-1e30)[None, :]

    # fc1 weight rows remapped: s1 rows -> [0,500), s2 rows -> [512,1012),
    # everything else (incl. padded output cols) zero.
    w1b = w1.astype(bf16)
    w1p = jnp.zeros((DIM_CAT_P, DIM2_P), bf16)
    w1p = w1p.at[:DIM_MASK, :DIM2].set(w1b[:DIM_MASK])
    w1p = w1p.at[DIM_MASK_P:DIM_MASK_P + DIM_MASK, :DIM2].set(
        w1b[DIM_MASK:2 * DIM_MASK])
    b1p = jnp.pad(b1.astype(f32), (0, DIM2_P - DIM2))[None, :]

    w2p = jnp.pad(w2[:, 0].astype(f32), (0, DIM2_P - DIM2))[None, :]
    b2p = b2.astype(f32)[None, :]

    batch_map = lambda i: (i, 0)
    const_map = lambda i: (0, 0)   # weights: same block every step (fetched once)

    flops = 2 * b_pad * (DIM_IN_P * DIM_MASK_P + DIM_CAT_P * DIM2_P + DIM2_P)
    transcendentals = b_pad * (DIM_MASK_P + DIM2_P + 1)   # exp + tanh + recip
    bytes_accessed = (xp.size * 2 + wmp.size * 2 + w1p.size * 2 +
                      (bmp.size + b1p.size + w2p.size + b2p.size) * 4 +
                      b_pad * DIM_OUT * 4)

    out = pl.pallas_call(
        _masked_rank2_kernel,
        out_shape=jax.ShapeDtypeStruct((b_pad, DIM_OUT), jnp.float32),
        grid=(b_pad // tile,),
        in_specs=[
            pl.BlockSpec((tile, DIM_IN_P), batch_map),        # packed x (bf16)
            pl.BlockSpec((DIM_IN_P, DIM_MASK_P), const_map),  # li_mask W (bf16)
            pl.BlockSpec((1, DIM_MASK_P), const_map),         # li_mask b (f32)
            pl.BlockSpec((DIM_CAT_P, DIM2_P), const_map),     # fc1 W (bf16)
            pl.BlockSpec((1, DIM2_P), const_map),             # fc1 b (f32)
            pl.BlockSpec((1, DIM2_P), const_map),             # fc2 W row (f32)
            pl.BlockSpec((1, DIM_OUT), const_map),            # fc2 b (f32)
        ],
        out_specs=pl.BlockSpec((tile, DIM_OUT), batch_map),
        compiler_params=pltpu.CompilerParams(
            dimension_semantics=("parallel",),
            vmem_limit_bytes=32 * 1024 * 1024),
        cost_estimate=pl.CostEstimate(
            flops=flops, transcendentals=transcendentals,
            bytes_accessed=bytes_accessed),
    )(xp, wmp, bmp, w1p, b1p, w2p, b2p)

    return out[:B]


def _reference(x, wm, bm, w1, b1, w2, b2):
    """Pure-JAX reference with the same bf16-operand / f32-accumulate recipe."""
    bf16 = jnp.bfloat16
    proj = jnp.dot(x.astype(bf16), wm.astype(bf16),
                   preferred_element_type=jnp.float32) + bm[None, :]
    mask = jax.nn.softmax(proj, axis=-1)
    s1 = x[:, :DIM_MASK]
    s2 = x[:, DIM_MASK:2 * DIM_MASK]
    masked = jnp.concatenate([mask * s1, mask * s2], axis=-1)
    h = jnp.tanh(jnp.dot(masked.astype(bf16), w1.astype(bf16),
                         preferred_element_type=jnp.float32) + b1[None, :])
    return jnp.sum(h * w2[:, 0][None, :], axis=-1, keepdims=True) + b2[None, :]


if __name__ == "__main__":
    key = jax.random.PRNGKey(0)
    keys = jax.random.split(key, 8)

    # Deterministic synthetic parameters, shapes per the module __init__
    # (weights stored as (in_features, out_features)).
    wm = jax.random.normal(keys[1], (DIM_IN, DIM_MASK), jnp.float32) * 0.02
    bm = jax.random.normal(keys[2], (DIM_MASK,), jnp.float32) * 0.1
    w1 = jax.random.normal(keys[3], (2 * DIM_MASK, DIM2), jnp.float32) * 0.05
    b1 = jax.random.normal(keys[4], (DIM2,), jnp.float32) * 0.1
    w2 = jax.random.normal(keys[5], (DIM_OUT if False else DIM2, DIM_OUT),
                           jnp.float32) * 0.3
    b2 = jax.random.normal(keys[6], (DIM_OUT,), jnp.float32) * 0.1

    # Two batch sizes: one below the 16-row minimum tile (single step) and one
    # that exercises the batch-padding + >=2-grid-step path.
    for bkey, B in ((keys[0], 12), (keys[7], 40)):
        x = jax.random.normal(bkey, (B, DIM_IN), jnp.float32)

        out = masked_model_rank2(x, wm, bm, w1, b1, w2, b2)
        out = jax.block_until_ready(out)

        ref = _reference(x, wm, bm, w1, b1, w2, b2)
        assert out.shape == (B, DIM_OUT)
        assert bool(jnp.all(jnp.isfinite(out)))
        assert jnp.allclose(out, ref, atol=1e-3, rtol=1e-3), (
            B, float(jnp.max(jnp.abs(out - ref))))

    print("KERNEL_OK")
</pallas_src>

<mosaic_0001>
module attributes {stable_mosaic.version = 11 : i64} {
  func.func @_masked_rank2_kernel(%arg0: i32, %arg1: memref<16x1536xbf16, #tpu.memory_space<vmem>>, %arg2: memref<1536x512xbf16, #tpu.memory_space<vmem>>, %arg3: memref<1x512xf32, #tpu.memory_space<vmem>>, %arg4: memref<1024x128xbf16, #tpu.memory_space<vmem>>, %arg5: memref<1x128xf32, #tpu.memory_space<vmem>>, %arg6: memref<1x128xf32, #tpu.memory_space<vmem>>, %arg7: memref<1x1xf32, #tpu.memory_space<vmem>>, %arg8: memref<16x1xf32, #tpu.memory_space<vmem>>) attributes {dimension_semantics = [#tpu.dimension_semantics<parallel>], iteration_bounds = array<i64: 1>, scalar_prefetch = 0 : i64, scratch_operands = 0 : i64, tpu.core_type = #tpu.core_type<tc>, window_params = [{transform_indices = @transform_0, window_bounds = array<i64: 16, 1536>}, {pipeline_mode = #tpu.pipeline_mode<synchronous>, transform_indices = @transform_1, window_bounds = array<i64: 1536, 512>}, {pipeline_mode = #tpu.pipeline_mode<synchronous>, transform_indices = @transform_2, window_bounds = array<i64: 1, 512>}, {pipeline_mode = #tpu.pipeline_mode<synchronous>, transform_indices = @transform_3, window_bounds = array<i64: 1024, 128>}, {pipeline_mode = #tpu.pipeline_mode<synchronous>, transform_indices = @transform_4, window_bounds = array<i64: 1, 128>}, {pipeline_mode = #tpu.pipeline_mode<synchronous>, transform_indices = @transform_5, window_bounds = array<i64: 1, 128>}, {pipeline_mode = #tpu.pipeline_mode<synchronous>, transform_indices = @transform_6, window_bounds = array<i64: 1, 1>}, {transform_indices = @transform_7, window_bounds = array<i64: 16, 1>}]} {
    %c0 = arith.constant 0 : index
    %c0_0 = arith.constant 0 : index
    %0 = vector.load %arg1[%c0, %c0_0] : memref<16x1536xbf16, #tpu.memory_space<vmem>>, vector<16x1536xbf16>
    %c0_1 = arith.constant 0 : index
    %c0_2 = arith.constant 0 : index
    %1 = vector.load %arg2[%c0_1, %c0_2] : memref<1536x512xbf16, #tpu.memory_space<vmem>>, vector<1536x512xbf16>
    %cst = arith.constant dense<0.000000e+00> : vector<16x512xf32>
    %2 = tpu.matmul %0, %1, %cst {dimension_numbers = #tpu.dot_dimension_numbers<[1], [0], [0], [1], [0, 0, 1, 1], [], []>} : vector<16x1536xbf16>, vector<1536x512xbf16>, vector<16x512xf32> -> vector<16x512xf32>
    %c0_3 = arith.constant 0 : index
    %c0_4 = arith.constant 0 : index
    %3 = vector.load %arg3[%c0_3, %c0_4] : memref<1x512xf32, #tpu.memory_space<vmem>>, vector<1x512xf32>
    %4 = vector.broadcast %3 : vector<1x512xf32> to vector<16x512xf32>
    %5 = arith.addf %2, %4 : vector<16x512xf32>
    %cst_5 = arith.constant dense<0xFF800000> : vector<16xf32>
    %6 = vector.multi_reduction <maximumf>, %5, %cst_5 [1] : vector<16x512xf32> to vector<16xf32>
    %7 = vector.shape_cast %6 : vector<16xf32> to vector<16x1xf32>
    %8 = vector.broadcast %7 : vector<16x1xf32> to vector<16x512xf32>
    %9 = arith.subf %5, %8 : vector<16x512xf32>
    %10 = math.exp %9 : vector<16x512xf32>
    %cst_6 = arith.constant dense<0.000000e+00> : vector<16xf32>
    %11 = vector.multi_reduction <add>, %10, %cst_6 [1] : vector<16x512xf32> to vector<16xf32>
    %12 = vector.shape_cast %11 : vector<16xf32> to vector<16x1xf32>
    %13 = tpu.reciprocal %12 {approx = true} : vector<16x1xf32> -> vector<16x1xf32>
    %14 = vector.broadcast %13 : vector<16x1xf32> to vector<16x512xf32>
    %15 = arith.mulf %10, %14 : vector<16x512xf32>
    %16 = arith.truncf %15 : vector<16x512xf32> to vector<16x512xbf16>
    %17 = vector.extract_strided_slice %0 {offsets = [0, 0], sizes = [16, 512], strides = [1, 1]} : vector<16x1536xbf16> to vector<16x512xbf16>
    %18 = vector.extract_strided_slice %0 {offsets = [0, 512], sizes = [16, 512], strides = [1, 1]} : vector<16x1536xbf16> to vector<16x512xbf16>
    %19 = arith.mulf %16, %17 : vector<16x512xbf16>
    %c0_7 = arith.constant 0 : index
    %c0_8 = arith.constant 0 : index
    %20 = vector.load %arg4[%c0_7, %c0_8] : memref<1024x128xbf16, #tpu.memory_space<vmem>>, vector<512x128xbf16>
    %cst_9 = arith.constant dense<0.000000e+00> : vector<16x128xf32>
    %21 = tpu.matmul %19, %20, %cst_9 {dimension_numbers = #tpu.dot_dimension_numbers<[1], [0], [0], [1], [0, 0, 1, 1], [], []>} : vector<16x512xbf16>, vector<512x128xbf16>, vector<16x128xf32> -> vector<16x128xf32>
    %22 = arith.mulf %16, %18 : vector<16x512xbf16>
    %c512 = arith.constant 512 : index
    %c0_10 = arith.constant 0 : index
    %23 = vector.load %arg4[%c512, %c0_10] : memref<1024x128xbf16, #tpu.memory_space<vmem>>, vector<512x128xbf16>
    %cst_11 = arith.constant dense<0.000000e+00> : vector<16x128xf32>
    %24 = tpu.matmul %22, %23, %cst_11 {dimension_numbers = #tpu.dot_dimension_numbers<[1], [0], [0], [1], [0, 0, 1, 1], [], []>} : vector<16x512xbf16>, vector<512x128xbf16>, vector<16x128xf32> -> vector<16x128xf32>
    %25 = arith.addf %21, %24 : vector<16x128xf32>
    %c0_12 = arith.constant 0 : index
    %c0_13 = arith.constant 0 : index
    %26 = vector.load %arg5[%c0_12, %c0_13] : memref<1x128xf32, #tpu.memory_space<vmem>>, vector<1x128xf32>
    %27 = vector.broadcast %26 : vector<1x128xf32> to vector<16x128xf32>
    %28 = arith.addf %25, %27 : vector<16x128xf32>
    %29 = math.tanh %28 : vector<16x128xf32>
    %c0_14 = arith.constant 0 : index
    %c0_15 = arith.constant 0 : index
    %30 = vector.load %arg6[%c0_14, %c0_15] : memref<1x128xf32, #tpu.memory_space<vmem>>, vector<1x128xf32>
    %31 = vector.broadcast %30 : vector<1x128xf32> to vector<16x128xf32>
    %32 = arith.mulf %29, %31 : vector<16x128xf32>
    %cst_16 = arith.constant dense<0.000000e+00> : vector<16xf32>
    %33 = vector.multi_reduction <add>, %32, %cst_16 [1] : vector<16x128xf32> to vector<16xf32>
    %34 = vector.shape_cast %33 : vector<16xf32> to vector<16x1xf32>
    %c0_17 = arith.constant 0 : index
    %c0_18 = arith.constant 0 : index
    %35 = vector.load %arg7[%c0_17, %c0_18] : memref<1x1xf32, #tpu.memory_space<vmem>>, vector<1x1xf32>
    %36 = vector.broadcast %35 : vector<1x1xf32> to vector<16x1xf32>
    %37 = arith.addf %34, %36 : vector<16x1xf32>
    %c0_19 = arith.constant 0 : index
    %c0_20 = arith.constant 0 : index
    %38 = vector.load %arg8[%c0_19, %c0_20] : memref<16x1xf32, #tpu.memory_space<vmem>>, vector<16x1xf32>
    tpu.vector_store %arg8[%c0_19, %c0_20], %37 {strides = array<i32>} : memref<16x1xf32, #tpu.memory_space<vmem>>, vector<16x1xf32>,
    return
  }
  func.func @transform_0(%arg0: i32) -> (i32, i32) {
    %c0_i32 = arith.constant 0 : i32
    %c0_i32_0 = arith.constant 0 : i32
    return %arg0, %c0_i32 : i32, i32
  }
  func.func @transform_1(%arg0: i32) -> (i32, i32) {
    %c0_i32 = arith.constant 0 : i32
    %c0_i32_0 = arith.constant 0 : i32
    %c0_i32_1 = arith.constant 0 : i32
    return %c0_i32, %c0_i32_0 : i32, i32
  }
  func.func @transform_2(%arg0: i32) -> (i32, i32) {
    %c0_i32 = arith.constant 0 : i32
    %c0_i32_0 = arith.constant 0 : i32
    %c0_i32_1 = arith.constant 0 : i32
    return %c0_i32, %c0_i32_0 : i32, i32
  }
  func.func @transform_3(%arg0: i32) -> (i32, i32) {
    %c0_i32 = arith.constant 0 : i32
    %c0_i32_0 = arith.constant 0 : i32
    %c0_i32_1 = arith.constant 0 : i32
    return %c0_i32, %c0_i32_0 : i32, i32
  }
  func.func @transform_4(%arg0: i32) -> (i32, i32) {
    %c0_i32 = arith.constant 0 : i32
    %c0_i32_0 = arith.constant 0 : i32
    %c0_i32_1 = arith.constant 0 : i32
    return %c0_i32, %c0_i32_0 : i32, i32
  }
  func.func @transform_5(%arg0: i32) -> (i32, i32) {
    %c0_i32 = arith.constant 0 : i32
    %c0_i32_0 = arith.constant 0 : i32
    %c0_i32_1 = arith.constant 0 : i32
    return %c0_i32, %c0_i32_0 : i32, i32
  }
  func.func @transform_6(%arg0: i32) -> (i32, i32) {
    %c0_i32 = arith.constant 0 : i32
    %c0_i32_0 = arith.constant 0 : i32
    %c0_i32_1 = arith.constant 0 : i32
    return %c0_i32, %c0_i32_0 : i32, i32
  }
  func.func @transform_7(%arg0: i32) -> (i32, i32) {
    %c0_i32 = arith.constant 0 : i32
    %c0_i32_0 = arith.constant 0 : i32
    return %arg0, %c0_i32 : i32, i32
  }
}

</mosaic_0001>

<bundles_post_ra>
// kernel: masked_model_rank2.1
= control target key start
LH: loop header
LB: loop body
LE: loop exit
PB: predicated region body
PF: predicated region fallthrough
CT: control target
= control target key end

     0   :  { %vm3718_vm0 = vcmask 7168   ;;  %s6540_s1 = inlined_call_operand.vmem [shape: bf16[1536,512], index: 1, kind: input, shape index: {}]   ;;  %s6541_s0 = inlined_call_operand.vmem [shape: bf16[16,1536], index: 0, kind: input, shape index: {}]   ;;  %s6542_s2 = inlined_call_operand.vmem [shape: f32[1,512], index: 2, kind: input, shape index: {}]   ;;  %s6543_s3 = inlined_call_operand.vmem [shape: bf16[1024,128], index: 3, kind: input, shape index: {}]   ;;  %s6544_s6 = inlined_call_operand.<no memory space> [shape: f32[1,1], index: 6, kind: input, shape index: {}]   ;;  %s6545_s4 = inlined_call_operand.vmem [shape: f32[1,128], index: 4, kind: input, shape index: {}]   ;;  %s6546_s5 = inlined_call_operand.vmem [shape: f32[1,128], index: 5, kind: input, shape index: {}]   ;;  %s6547_s7 = inlined_call_operand.vmem [shape: f32[16,1], index: 7, kind: output, shape index: {}]  }
   0x1   :  { %v4276_v0 = vld [vmem:[%s6540_s1 + $0xe4] ss:$16 sps:$4 sm:$0xff]   ;;  %v4280_v2 = vld [vmem:[%s6540_s1 + $0xe0] ss:$16 sps:$4 sm:$0xff]   ;;  %v4374_v50 = vld [vmem:[%s6541_s0 + $0xc] ss:$48 sps:$4 sm:$0xff]  }
   0x2   :  { %v4278_v1 = vld [vmem:[%s6540_s1 + $0x2e4] ss:$16 sps:$4 sm:$0xff]   ;;  %2427 = vmatprep.subr.bf16.mxu0 %v4276_v0  ;;  %v4281_v3 = vld [vmem:[%s6540_s1 + $0x2e0] ss:$16 sps:$4 sm:$0xff]   ;;  %2502 = vmatprep.mubr.bf16.mxu1 %v4374_v50 }
   0x3   :  { %2470 = vmatprep.subr.bf16.mxu1 %v4278_v1  ;;  %v4282_v4 = vld [vmem:[%s6540_s1 + $0xc4] ss:$16 sps:$4 sm:$0xff]   ;;  %2428 = vmatpush1.bf16.msra.mxu0 %v4280_v2  ;;  %v4286_v6 = vld [vmem:[%s6540_s1 + $0xc0] ss:$16 sps:$4 sm:$0xff]  }
   0x4   :  { %2471 = vmatpush1.bf16.msra.mxu1 %v4281_v3  ;;  %v4284_v5 = vld [vmem:[%s6540_s1 + $0x2c4] ss:$16 sps:$4 sm:$0xff]   ;;  %2429 = vmatprep.subr.bf16.mxu0 %v4282_v4  ;;  %v4287_v7 = vld [vmem:[%s6540_s1 + $0x2c0] ss:$16 sps:$4 sm:$0xff]  }
   0x5   :  { %2472 = vmatprep.subr.bf16.mxu1 %v4284_v5  ;;  %v4288_v8 = vld [vmem:[%s6540_s1 + $0xa4] ss:$16 sps:$4 sm:$0xff]   ;;  %v4292_v10 = vld [vmem:[%s6540_s1 + $0xa0] ss:$16 sps:$4 sm:$0xff]   ;;  %v4377_v5 = vld [vmem:[%s6541_s0 + $0x8] ss:$48 sps:$4 sm:$0xff]  }
   0x6   :  { %v4290_v9 = vld [vmem:[%s6540_s1 + $0x2a4] ss:$16 sps:$4 sm:$0xff]   ;;  %v4293_v11 = vld [vmem:[%s6540_s1 + $0x2a0] ss:$16 sps:$4 sm:$0xff]  }
   0x7   :  { %2430 = vmatpush1.bf16.msra.mxu0 %v4286_v6  ;;  %v4294_v12 = vld [vmem:[%s6540_s1 + $0x84] ss:$16 sps:$4 sm:$0xff]   ;;  %v4298_v14 = vld [vmem:[%s6540_s1 + $0x80] ss:$16 sps:$4 sm:$0xff]  }
   0x8   :  { %2473 = vmatpush1.bf16.msra.mxu1 %v4287_v7  ;;  %2431 = vmatprep.subr.bf16.mxu0 %v4288_v8  ;;  %v4296_v13 = vld [vmem:[%s6540_s1 + $0x284] ss:$16 sps:$4 sm:$0xff]   ;;  %v4299_v15 = vld [vmem:[%s6540_s1 + $0x280] ss:$16 sps:$4 sm:$0xff]  }
   0x9   :  { %2474 = vmatprep.subr.bf16.mxu1 %v4290_v9  ;;  %v4300_v16 = vld [vmem:[%s6540_s1 + $0x64] ss:$16 sps:$4 sm:$0xff]   ;;  %v4304_v18 = vld [vmem:[%s6540_s1 + $0x60] ss:$16 sps:$4 sm:$0xff]  }
   0xa   :  { %v4302_v17 = vld [vmem:[%s6540_s1 + $0x264] ss:$16 sps:$4 sm:$0xff]   ;;  %v4305_v19 = vld [vmem:[%s6540_s1 + $0x260] ss:$16 sps:$4 sm:$0xff]  }
   0xb   :  { %2432 = vmatpush1.bf16.msra.mxu0 %v4292_v10  ;;  %v4306_v20 = vld [vmem:[%s6540_s1 + $0x44] ss:$16 sps:$4 sm:$0xff]   ;;  %v4310_v22 = vld [vmem:[%s6540_s1 + $0x40] ss:$16 sps:$4 sm:$0xff]  }
   0xc   :  { %2475 = vmatpush1.bf16.msra.mxu1 %v4293_v11  ;;  %2433 = vmatprep.subr.bf16.mxu0 %v4294_v12  ;;  %v4308_v21 = vld [vmem:[%s6540_s1 + $0x244] ss:$16 sps:$4 sm:$0xff]   ;;  %v4311_v23 = vld [vmem:[%s6540_s1 + $0x240] ss:$16 sps:$4 sm:$0xff]  }
   0xd   :  { %2476 = vmatprep.subr.bf16.mxu1 %v4296_v13  ;;  %v4312_v24 = vld [vmem:[%s6540_s1 + $0x24] ss:$16 sps:$4 sm:$0xff]   ;;  %v4316_v26 = vld [vmem:[%s6540_s1 + $0x20] ss:$16 sps:$4 sm:$0xff]  }
   0xe   :  { %v4314_v25 = vld [vmem:[%s6540_s1 + $0x224] ss:$16 sps:$4 sm:$0xff]   ;;  %v4317_v27 = vld [vmem:[%s6540_s1 + $0x220] ss:$16 sps:$4 sm:$0xff]  }
   0xf   :  { %2434 = vmatpush1.bf16.msra.mxu0 %v4298_v14  ;;  %v4318_v28 = vld [vmem:[%s6540_s1 + $0x4] ss:$16 sps:$4 sm:$0xff]   ;;  %v4322_v30 = vld [vmem:[%s6540_s1] ss:$16 sps:$4 sm:$0xff]  }
  0x10   :  { %2477 = vmatpush1.bf16.msra.mxu1 %v4299_v15  ;;  %2435 = vmatprep.subr.bf16.mxu0 %v4300_v16  ;;  %v4320_v29 = vld [vmem:[%s6540_s1 + $0x204] ss:$16 sps:$4 sm:$0xff]   ;;  %v4323_v31 = vld [vmem:[%s6540_s1 + $0x200] ss:$16 sps:$4 sm:$0xff]  }
  0x11   :  { %2478 = vmatprep.subr.bf16.mxu1 %v4302_v17  ;;  %v4324_v32 = vld [vmem:[%s6540_s1 + $0x1e4] ss:$16 sps:$4 sm:$0xff]   ;;  %v4328_v34 = vld [vmem:[%s6540_s1 + $0x1e0] ss:$16 sps:$4 sm:$0xff]  }
  0x12   :  { %v4326_v33 = vld [vmem:[%s6540_s1 + $0x3e4] ss:$16 sps:$4 sm:$0xff]   ;;  %v4329_v35 = vld [vmem:[%s6540_s1 + $0x3e0] ss:$16 sps:$4 sm:$0xff]  }
  0x13   :  { %2436 = vmatpush1.bf16.msra.mxu0 %v4304_v18  ;;  %v4330_v36 = vld [vmem:[%s6540_s1 + $0x1c4] ss:$16 sps:$4 sm:$0xff]   ;;  %v4334_v38 = vld [vmem:[%s6540_s1 + $0x1c0] ss:$16 sps:$4 sm:$0xff]  }
  0x14   :  { %2479 = vmatpush1.bf16.msra.mxu1 %v4305_v19  ;;  %2437 = vmatprep.subr.bf16.mxu0 %v4306_v20  ;;  %v4332_v37 = vld [vmem:[%s6540_s1 + $0x3c4] ss:$16 sps:$4 sm:$0xff]   ;;  %v4335_v39 = vld [vmem:[%s6540_s1 + $0x3c0] ss:$16 sps:$4 sm:$0xff]  }
  0x15   :  { %2480 = vmatprep.subr.bf16.mxu1 %v4308_v21  ;;  %v4336_v40 = vld [vmem:[%s6540_s1 + $0x1a4] ss:$16 sps:$4 sm:$0xff]   ;;  %v4340_v42 = vld [vmem:[%s6540_s1 + $0x1a0] ss:$16 sps:$4 sm:$0xff]  }
  0x16   :  { %v4338_v41 = vld [vmem:[%s6540_s1 + $0x3a4] ss:$16 sps:$4 sm:$0xff]   ;;  %v4341_v43 = vld [vmem:[%s6540_s1 + $0x3a0] ss:$16 sps:$4 sm:$0xff]  }
  0x17   :  { %2438 = vmatpush1.bf16.msra.mxu0 %v4310_v22  ;;  %v4342_v44 = vld [vmem:[%s6540_s1 + $0x184] ss:$16 sps:$4 sm:$0xff]   ;;  %v4346_v46 = vld [vmem:[%s6540_s1 + $0x180] ss:$16 sps:$4 sm:$0xff]  }
  0x18   :  { %2481 = vmatpush1.bf16.msra.mxu1 %v4311_v23  ;;  %2439 = vmatprep.subr.bf16.mxu0 %v4312_v24  ;;  %v4344_v45 = vld [vmem:[%s6540_s1 + $0x384] ss:$16 sps:$4 sm:$0xff]   ;;  %v4347_v47 = vld [vmem:[%s6540_s1 + $0x380] ss:$16 sps:$4 sm:$0xff]  }
  0x19   :  { %2482 = vmatprep.subr.bf16.mxu1 %v4314_v25  ;;  %v4372_v48 = vld [vmem:[%s6541_s0 + $0x4] ss:$48 sps:$4 sm:$0xff]   ;;  %v4352_v52 = vld [vmem:[%s6540_s1 + $0x160] ss:$16 sps:$4 sm:$0xff]  }
  0x1a   :  { %v4348_v49 = vld [vmem:[%s6540_s1 + $0x164] ss:$16 sps:$4 sm:$0xff]   ;;  %2459 = vmatprep.mubr.bf16.mxu0 %v4372_v48  ;;  %v4353_v53 = vld [vmem:[%s6540_s1 + $0x360] ss:$16 sps:$4 sm:$0xff]  }
  0x1b   :  { %2440 = vmatpush1.bf16.msra.mxu0 %v4316_v26  ;;  %v4350_v51 = vld [vmem:[%s6540_s1 + $0x364] ss:$16 sps:$4 sm:$0xff]   ;;  %v4358_v56 = vld [vmem:[%s6540_s1 + $0x140] ss:$16 sps:$4 sm:$0xff]  }
  0x1c   :  { %2483 = vmatpush1.bf16.msra.mxu1 %v4317_v27  ;;  %2441 = vmatprep.subr.bf16.mxu0 %v4318_v28  ;;  %v4354_v54 = vld [vmem:[%s6540_s1 + $0x144] ss:$16 sps:$4 sm:$0xff]   ;;  %v4359_v57 = vld [vmem:[%s6540_s1 + $0x340] ss:$16 sps:$4 sm:$0xff]  }
  0x1d   :  { %2484 = vmatprep.subr.bf16.mxu1 %v4320_v29  ;;  %v4356_v55 = vld [vmem:[%s6540_s1 + $0x344] ss:$16 sps:$4 sm:$0xff]   ;;  %v4364_v60 = vld [vmem:[%s6540_s1 + $0x120] ss:$16 sps:$4 sm:$0xff]  }
  0x1e   :  { %v4360_v58 = vld [vmem:[%s6540_s1 + $0x124] ss:$16 sps:$4 sm:$0xff]   ;;  %v4365_v61 = vld [vmem:[%s6540_s1 + $0x320] ss:$16 sps:$4 sm:$0xff]  }
  0x1f   :  { %2442 = vmatpush1.bf16.msra.mxu0 %v4322_v30  ;;  %v4362_v59 = vld [vmem:[%s6540_s1 + $0x324] ss:$16 sps:$4 sm:$0xff]   ;;  %v4370_v0 = vld [vmem:[%s6540_s1 + $0x100] ss:$16 sps:$4 sm:$0xff]  }
  0x20   :  { %2485 = vmatpush1.bf16.msra.mxu1 %v4323_v31  ;;  %2443 = vmatprep.subr.bf16.mxu0 %v4324_v32  ;;  %v4366_v62 = vld [vmem:[%s6540_s1 + $0x104] ss:$16 sps:$4 sm:$0xff]   ;;  %v4371_v1 = vld [vmem:[%s6540_s1 + $0x300] ss:$16 sps:$4 sm:$0xff]  }
  0x21   :  { %2486 = vmatprep.subr.bf16.mxu1 %v4326_v33  ;;  %v4368_v63 = vld [vmem:[%s6540_s1 + $0x304] ss:$16 sps:$4 sm:$0xff]   ;;  %v4376_v4 = vld [vmem:[%s6541_s0] ss:$48 sps:$4 sm:$0xff]  }
  0x22   :  { %v4380_v2 = vld [vmem:[%s6540_s1 + $0x4e4] ss:$16 sps:$4 sm:$0xff]   ;;  %v4378_v6 = vld [vmem:[%s6540_s1 + $0x4e0] ss:$16 sps:$4 sm:$0xff]  }
  0x23   :  { %2444 = vmatpush2.bf16.msra.mxu0 %v4328_v34  ;;  %v4383_v3 = vld [vmem:[%s6540_s1 + $0x6e4] ss:$16 sps:$4 sm:$0xff]   ;;  %v4381_v7 = vld [vmem:[%s6540_s1 + $0x6e0] ss:$16 sps:$4 sm:$0xff]  }
  0x24   :  { %2487 = vmatpush2.bf16.msra.mxu1 %v4329_v35  ;;  %2445 = vmatprep.subr.bf16.mxu0 %v4330_v36  ;;  %v4386_v8 = vld [vmem:[%s6540_s1 + $0x4c4] ss:$16 sps:$4 sm:$0xff]   ;;  %v4384_v10 = vld [vmem:[%s6540_s1 + $0x4c0] ss:$16 sps:$4 sm:$0xff]   ;;  %v4479_v35 = vld [vmem:[%s6541_s0 + $0x1c] ss:$48 sps:$4 sm:$0xff]  }
  0x25   :  { %2488 = vmatprep.subr.bf16.mxu1 %v4332_v37  ;;  %v4389_v9 = vld [vmem:[%s6540_s1 + $0x6c4] ss:$16 sps:$4 sm:$0xff]   ;;  %v4387_v11 = vld [vmem:[%s6540_s1 + $0x6c0] ss:$16 sps:$4 sm:$0xff]  }
  0x26   :  { %v4392_v12 = vld [vmem:[%s6540_s1 + $0x4a4] ss:$16 sps:$4 sm:$0xff]   ;;  %v4390_v14 = vld [vmem:[%s6540_s1 + $0x4a0] ss:$16 sps:$4 sm:$0xff]  }
  0x27   :  { %2446 = vmatpush2.bf16.msra.mxu0 %v4334_v38  ;;  %v4395_v13 = vld [vmem:[%s6540_s1 + $0x6a4] ss:$16 sps:$4 sm:$0xff]   ;;  %v4393_v15 = vld [vmem:[%s6540_s1 + $0x6a0] ss:$16 sps:$4 sm:$0xff]  }
  0x28   :  { %2489 = vmatpush2.bf16.msra.mxu1 %v4335_v39  ;;  %2447 = vmatprep.subr.bf16.mxu0 %v4336_v40  ;;  %v4398_v16 = vld [vmem:[%s6540_s1 + $0x484] ss:$16 sps:$4 sm:$0xff]   ;;  %v4396_v18 = vld [vmem:[%s6540_s1 + $0x480] ss:$16 sps:$4 sm:$0xff]  }
  0x29   :  { %2490 = vmatprep.subr.bf16.mxu1 %v4338_v41  ;;  %v4401_v17 = vld [vmem:[%s6540_s1 + $0x684] ss:$16 sps:$4 sm:$0xff]   ;;  %v4399_v19 = vld [vmem:[%s6540_s1 + $0x680] ss:$16 sps:$4 sm:$0xff]  }
  0x2a   :  { %v4404_v20 = vld [vmem:[%s6540_s1 + $0x464] ss:$16 sps:$4 sm:$0xff]   ;;  %v4402_v22 = vld [vmem:[%s6540_s1 + $0x460] ss:$16 sps:$4 sm:$0xff]  }
  0x2b   :  { %2448 = vmatpush2.bf16.msra.mxu0 %v4340_v42  ;;  %v4407_v21 = vld [vmem:[%s6540_s1 + $0x664] ss:$16 sps:$4 sm:$0xff]   ;;  %v4405_v23 = vld [vmem:[%s6540_s1 + $0x660] ss:$16 sps:$4 sm:$0xff]  }
  0x2c   :  { %2491 = vmatpush2.bf16.msra.mxu1 %v4341_v43  ;;  %2449 = vmatprep.subr.bf16.mxu0 %v4342_v44  ;;  %v4410_v24 = vld [vmem:[%s6540_s1 + $0x444] ss:$16 sps:$4 sm:$0xff]   ;;  %v4408_v26 = vld [vmem:[%s6540_s1 + $0x440] ss:$16 sps:$4 sm:$0xff]  }
  0x2d   :  { %2492 = vmatprep.subr.bf16.mxu1 %v4344_v45  ;;  %v4413_v25 = vld [vmem:[%s6540_s1 + $0x644] ss:$16 sps:$4 sm:$0xff]   ;;  %v4411_v27 = vld [vmem:[%s6540_s1 + $0x640] ss:$16 sps:$4 sm:$0xff]  }
  0x2e   :  { %v4416_v28 = vld [vmem:[%s6540_s1 + $0x424] ss:$16 sps:$4 sm:$0xff]   ;;  %v4414_v30 = vld [vmem:[%s6540_s1 + $0x420] ss:$16 sps:$4 sm:$0xff]  }
  0x2f   :  { %2450 = vmatpush2.bf16.msra.mxu0 %v4346_v46  ;;  %v4419_v29 = vld [vmem:[%s6540_s1 + $0x624] ss:$16 sps:$4 sm:$0xff]   ;;  %v4417_v31 = vld [vmem:[%s6540_s1 + $0x620] ss:$16 sps:$4 sm:$0xff]  }
  0x30   :  { %2493 = vmatpush2.bf16.msra.mxu1 %v4347_v47  ;;  %2451 = vmatprep.subr.bf16.mxu0 %v4348_v49  ;;  %v4422_v32 = vld [vmem:[%s6540_s1 + $0x404] ss:$16 sps:$4 sm:$0xff]   ;;  %v4420_v36 = vld [vmem:[%s6540_s1 + $0x400] ss:$16 sps:$4 sm:$0xff]  }
  0x31   :  { %2494 = vmatprep.subr.bf16.mxu1 %v4350_v51  ;;  %v4425_v33 = vld [vmem:[%s6540_s1 + $0x604] ss:$16 sps:$4 sm:$0xff]   ;;  %v4423_v37 = vld [vmem:[%s6540_s1 + $0x600] ss:$16 sps:$4 sm:$0xff]  }
  0x32   :  { %v4476_v34 = vld [vmem:[%s6541_s0 + $0x14] ss:$48 sps:$4 sm:$0xff]   ;;  %v4426_v40 = vld [vmem:[%s6540_s1 + $0x5e0] ss:$16 sps:$4 sm:$0xff]  }
  0x33   :  { %2452 = vmatpush2.bf16.msra.mxu0 %v4352_v52  ;;  %v4428_v38 = vld [vmem:[%s6540_s1 + $0x5e4] ss:$16 sps:$4 sm:$0xff]   ;;  %v4429_v41 = vld [vmem:[%s6540_s1 + $0x7e0] ss:$16 sps:$4 sm:$0xff]  }
  0x34   :  { %2495 = vmatpush2.bf16.msra.mxu1 %v4353_v53  ;;  %2453 = vmatprep.subr.bf16.mxu0 %v4354_v54  ;;  %v4431_v39 = vld [vmem:[%s6540_s1 + $0x7e4] ss:$16 sps:$4 sm:$0xff]   ;;  %v4432_v44 = vld [vmem:[%s6540_s1 + $0x5c0] ss:$16 sps:$4 sm:$0xff]  }
  0x35   :  { %2496 = vmatprep.subr.bf16.mxu1 %v4356_v55  ;;  %v4434_v42 = vld [vmem:[%s6540_s1 + $0x5c4] ss:$16 sps:$4 sm:$0xff]   ;;  %v4435_v45 = vld [vmem:[%s6540_s1 + $0x7c0] ss:$16 sps:$4 sm:$0xff]  }
  0x36   :  { %v4437_v43 = vld [vmem:[%s6540_s1 + $0x7c4] ss:$16 sps:$4 sm:$0xff]   ;;  %v4438_v48 = vld [vmem:[%s6540_s1 + $0x5a0] ss:$16 sps:$4 sm:$0xff]  }
  0x37   :  { %2454 = vmatpush2.bf16.msra.mxu0 %v4358_v56  ;;  %v4440_v46 = vld [vmem:[%s6540_s1 + $0x5a4] ss:$16 sps:$4 sm:$0xff]   ;;  %v4441_v49 = vld [vmem:[%s6540_s1 + $0x7a0] ss:$16 sps:$4 sm:$0xff]  }
  0x38   :  { %2497 = vmatpush2.bf16.msra.mxu1 %v4359_v57  ;;  %2455 = vmatprep.subr.bf16.mxu0 %v4360_v58  ;;  %v4443_v47 = vld [vmem:[%s6540_s1 + $0x7a4] ss:$16 sps:$4 sm:$0xff]   ;;  %v4444_v52 = vld [vmem:[%s6540_s1 + $0x580] ss:$16 sps:$4 sm:$0xff]  }
  0x39   :  { %2498 = vmatprep.subr.bf16.mxu1 %v4362_v59  ;;  %v4446_v50 = vld [vmem:[%s6540_s1 + $0x584] ss:$16 sps:$4 sm:$0xff]   ;;  %v4447_v53 = vld [vmem:[%s6540_s1 + $0x780] ss:$16 sps:$4 sm:$0xff]  }
  0x3a   :  { %v4449_v51 = vld [vmem:[%s6540_s1 + $0x784] ss:$16 sps:$4 sm:$0xff]   ;;  %v4450_v56 = vld [vmem:[%s6540_s1 + $0x560] ss:$16 sps:$4 sm:$0xff]  }
  0x3b   :  { %2456 = vmatpush2.bf16.msra.mxu0 %v4364_v60  ;;  %v4452_v54 = vld [vmem:[%s6540_s1 + $0x564] ss:$16 sps:$4 sm:$0xff]   ;;  %v4453_v57 = vld [vmem:[%s6540_s1 + $0x760] ss:$16 sps:$4 sm:$0xff]  }
  0x3c   :  { %2499 = vmatpush2.bf16.msra.mxu1 %v4365_v61  ;;  %2457 = vmatprep.subr.bf16.mxu0 %v4366_v62  ;;  %v4455_v55 = vld [vmem:[%s6540_s1 + $0x764] ss:$16 sps:$4 sm:$0xff]   ;;  %v4456_v60 = vld [vmem:[%s6540_s1 + $0x540] ss:$16 sps:$4 sm:$0xff]  }
  0x3d   :  { %2500 = vmatprep.subr.bf16.mxu1 %v4368_v63  ;;  %v4458_v58 = vld [vmem:[%s6540_s1 + $0x544] ss:$16 sps:$4 sm:$0xff]   ;;  %v4459_v61 = vld [vmem:[%s6540_s1 + $0x740] ss:$16 sps:$4 sm:$0xff]  }
  0x3e   :  { %v4461_v59 = vld [vmem:[%s6540_s1 + $0x744] ss:$16 sps:$4 sm:$0xff]  }
  0x3f   :  { %2458 = vmatpush2.bf16.msra.mxu0 %v4370_v0  ;;  %v4464_v62 = vld [vmem:[%s6540_s1 + $0x524] ss:$16 sps:$4 sm:$0xff]   ;;  %v4462_v0 = vld [vmem:[%s6540_s1 + $0x520] ss:$16 sps:$4 sm:$0xff]  }
  0x40   :  { %2501 = vmatpush2.bf16.msra.mxu1 %v4371_v1  ;;  %2513 = vmatprep.subr.bf16.mxu0 %v4380_v2  ;;  %v4467_v63 = vld [vmem:[%s6540_s1 + $0x724] ss:$16 sps:$4 sm:$0xff]   ;;  %v4465_v1 = vld [vmem:[%s6540_s1 + $0x720] ss:$16 sps:$4 sm:$0xff]  }
  0x41   :  { %2556 = vmatprep.subr.bf16.mxu1 %v4383_v3  ;;  %v4470_v2 = vld [vmem:[%s6540_s1 + $0x504] ss:$16 sps:$4 sm:$0xff]  }
  0x42   :  { %2460 = vmatmul.mubr.bf16.vlgmr.msra.gmra.mxu0 %v4376_v4  ;;  %v4473_v3 = vld [vmem:[%s6540_s1 + $0x704] ss:$16 sps:$4 sm:$0xff]   ;;  %v4468_v4 = vld [vmem:[%s6540_s1 + $0x500] ss:$16 sps:$4 sm:$0xff]  }
  0x43   :  { %2503 = vmatmul.mubr.bf16.vlgmr.msra.gmra.mxu1 %v4377_v5  ;;  %2514 = vmatpush1.bf16.msra.mxu0 %v4378_v6  ;;  %v4471_v5 = vld [vmem:[%s6540_s1 + $0x700] ss:$16 sps:$4 sm:$0xff]   ;;  %v4482_v6 = vld [vmem:[%s6540_s1 + $0x8e4] ss:$16 sps:$4 sm:$0xff]  }
  0x44   :  { %2557 = vmatpush1.bf16.msra.mxu1 %v4381_v7  ;;  %2515 = vmatprep.subr.bf16.mxu0 %v4386_v8  ;;  %v4485_v7 = vld [vmem:[%s6540_s1 + $0xae4] ss:$16 sps:$4 sm:$0xff]   ;;  %v4474_v8 = vld [vmem:[%s6541_s0 + $0x10] ss:$48 sps:$4 sm:$0xff]  }
  0x45   :  { %2558 = vmatprep.subr.bf16.mxu1 %v4389_v9  ;;  %2545 = vmatprep.mubr.bf16.mxu0 %v4476_v34  ;;  %v4477_v9 = vld [vmem:[%s6541_s0 + $0x18] ss:$48 sps:$4 sm:$0xff]   ;;  %v4518_v34 = vld [vmem:[%s6540_s1 + $0x824] ss:$16 sps:$4 sm:$0xff]  }
  0x46   :  { %2588 = vmatprep.mubr.bf16.mxu1 %v4479_v35  ;;  %v4521_v35 = vld [vmem:[%s6540_s1 + $0xa24] ss:$16 sps:$4 sm:$0xff]  }
  0x47   :  { %2516 = vmatpush1.bf16.msra.mxu0 %v4384_v10  ;;  %v4480_v10 = vld [vmem:[%s6540_s1 + $0x8e0] ss:$16 sps:$4 sm:$0xff]  }
  0x48   :  { %2559 = vmatpush1.bf16.msra.mxu1 %v4387_v11  ;;  %2517 = vmatprep.subr.bf16.mxu0 %v4392_v12  ;;  %v4483_v11 = vld [vmem:[%s6540_s1 + $0xae0] ss:$16 sps:$4 sm:$0xff]   ;;  %v4488_v12 = vld [vmem:[%s6540_s1 + $0x8c4] ss:$16 sps:$4 sm:$0xff]  }
  0x49   :  { %2560 = vmatprep.subr.bf16.mxu1 %v4395_v13  ;;  %v4491_v13 = vld [vmem:[%s6540_s1 + $0xac4] ss:$16 sps:$4 sm:$0xff]  }
  0x4b   :  { %2518 = vmatpush1.bf16.msra.mxu0 %v4390_v14  ;;  %v4486_v14 = vld [vmem:[%s6540_s1 + $0x8c0] ss:$16 sps:$4 sm:$0xff]  }
  0x4c   :  { %2561 = vmatpush1.bf16.msra.mxu1 %v4393_v15  ;;  %2519 = vmatprep.subr.bf16.mxu0 %v4398_v16  ;;  %v4489_v15 = vld [vmem:[%s6540_s1 + $0xac0] ss:$16 sps:$4 sm:$0xff]   ;;  %v4494_v16 = vld [vmem:[%s6540_s1 + $0x8a4] ss:$16 sps:$4 sm:$0xff]  }
  0x4d   :  { %2562 = vmatprep.subr.bf16.mxu1 %v4401_v17  ;;  %v4497_v17 = vld [vmem:[%s6540_s1 + $0xaa4] ss:$16 sps:$4 sm:$0xff]  }
  0x4f   :  { %2520 = vmatpush1.bf16.msra.mxu0 %v4396_v18  ;;  %v4492_v18 = vld [vmem:[%s6540_s1 + $0x8a0] ss:$16 sps:$4 sm:$0xff]  }
  0x50   :  { %2563 = vmatpush1.bf16.msra.mxu1 %v4399_v19  ;;  %2521 = vmatprep.subr.bf16.mxu0 %v4404_v20  ;;  %v4578_v19 = vld [vmem:[%s6541_s0 + $0x24] ss:$48 sps:$4 sm:$0xff]   ;;  %v4495_v20 = vld [vmem:[%s6540_s1 + $0xaa0] ss:$16 sps:$4 sm:$0xff]  }
  0x51   :  { %2564 = vmatprep.subr.bf16.mxu1 %v4407_v21  ;;  %v4581_v21 = vld [vmem:[%s6541_s0 + $0x2c] ss:$48 sps:$4 sm:$0xff]  }
  0x53   :  { %2522 = vmatpush1.bf16.msra.mxu0 %v4402_v22  ;;  %v4500_v22 = vld [vmem:[%s6540_s1 + $0x884] ss:$16 sps:$4 sm:$0xff]  }
  0x54   :  { %2565 = vmatpush1.bf16.msra.mxu1 %v4405_v23  ;;  %2523 = vmatprep.subr.bf16.mxu0 %v4410_v24  ;;  %v4503_v23 = vld [vmem:[%s6540_s1 + $0xa84] ss:$16 sps:$4 sm:$0xff]   ;;  %v4498_v24 = vld [vmem:[%s6540_s1 + $0x880] ss:$16 sps:$4 sm:$0xff]  }
  0x55   :  { %2566 = vmatprep.subr.bf16.mxu1 %v4413_v25  ;;  %v4501_v25 = vld [vmem:[%s6540_s1 + $0xa80] ss:$16 sps:$4 sm:$0xff]  }
  0x57   :  { %2524 = vmatpush1.bf16.msra.mxu0 %v4408_v26  ;;  %v4506_v26 = vld [vmem:[%s6540_s1 + $0x864] ss:$16 sps:$4 sm:$0xff]  }
  0x58   :  { %2567 = vmatpush1.bf16.msra.mxu1 %v4411_v27  ;;  %2525 = vmatprep.subr.bf16.mxu0 %v4416_v28  ;;  %v4509_v27 = vld [vmem:[%s6540_s1 + $0xa64] ss:$16 sps:$4 sm:$0xff]   ;;  %v4504_v28 = vld [vmem:[%s6540_s1 + $0x860] ss:$16 sps:$4 sm:$0xff]  }
  0x59   :  { %2568 = vmatprep.subr.bf16.mxu1 %v4419_v29  ;;  %v4507_v29 = vld [vmem:[%s6540_s1 + $0xa60] ss:$16 sps:$4 sm:$0xff]  }
  0x5b   :  { %2526 = vmatpush1.bf16.msra.mxu0 %v4414_v30  ;;  %v4512_v30 = vld [vmem:[%s6540_s1 + $0x844] ss:$16 sps:$4 sm:$0xff]  }
  0x5c   :  { %2569 = vmatpush1.bf16.msra.mxu1 %v4417_v31  ;;  %2527 = vmatprep.subr.bf16.mxu0 %v4422_v32  ;;  %v4515_v31 = vld [vmem:[%s6540_s1 + $0xa44] ss:$16 sps:$4 sm:$0xff]   ;;  %v4510_v32 = vld [vmem:[%s6540_s1 + $0x840] ss:$16 sps:$4 sm:$0xff]  }
  0x5d   :  { %2570 = vmatprep.subr.bf16.mxu1 %v4425_v33  ;;  %v4513_v33 = vld [vmem:[%s6540_s1 + $0xa40] ss:$16 sps:$4 sm:$0xff]  }
  0x5f   :  { %2528 = vmatpush1.bf16.msra.mxu0 %v4420_v36  ;;  %v4516_v36 = vld [vmem:[%s6540_s1 + $0x820] ss:$16 sps:$4 sm:$0xff]  }
  0x60   :  { %2571 = vmatpush1.bf16.msra.mxu1 %v4423_v37  ;;  %2529 = vmatprep.subr.bf16.mxu0 %v4428_v38  ;;  %v4519_v37 = vld [vmem:[%s6540_s1 + $0xa20] ss:$16 sps:$4 sm:$0xff]   ;;  %v4524_v38 = vld [vmem:[%s6540_s1 + $0x804] ss:$16 sps:$4 sm:$0xff]  }
  0x61   :  { %2572 = vmatprep.subr.bf16.mxu1 %v4431_v39  ;;  %v4527_v39 = vld [vmem:[%s6540_s1 + $0xa04] ss:$16 sps:$4 sm:$0xff]  }
  0x63   :  { %2530 = vmatpush2.bf16.msra.mxu0 %v4426_v40  ;;  %v4522_v40 = vld [vmem:[%s6540_s1 + $0x800] ss:$16 sps:$4 sm:$0xff]  }
  0x64   :  { %2573 = vmatpush2.bf16.msra.mxu1 %v4429_v41  ;;  %2531 = vmatprep.subr.bf16.mxu0 %v4434_v42  ;;  %v4525_v41 = vld [vmem:[%s6540_s1 + $0xa00] ss:$16 sps:$4 sm:$0xff]   ;;  %v4530_v42 = vld [vmem:[%s6540_s1 + $0x9e4] ss:$16 sps:$4 sm:$0xff]  }
  0x65   :  { %2574 = vmatprep.subr.bf16.mxu1 %v4437_v43  ;;  %v4533_v43 = vld [vmem:[%s6540_s1 + $0xbe4] ss:$16 sps:$4 sm:$0xff]  }
  0x67   :  { %2532 = vmatpush2.bf16.msra.mxu0 %v4432_v44  ;;  %v4528_v44 = vld [vmem:[%s6540_s1 + $0x9e0] ss:$16 sps:$4 sm:$0xff]  }
  0x68   :  { %2575 = vmatpush2.bf16.msra.mxu1 %v4435_v45  ;;  %2533 = vmatprep.subr.bf16.mxu0 %v4440_v46  ;;  %v4531_v45 = vld [vmem:[%s6540_s1 + $0xbe0] ss:$16 sps:$4 sm:$0xff]   ;;  %v4536_v46 = vld [vmem:[%s6540_s1 + $0x9c4] ss:$16 sps:$4 sm:$0xff]  }
  0x69   :  { %2576 = vmatprep.subr.bf16.mxu1 %v4443_v47  ;;  %v4539_v47 = vld [vmem:[%s6540_s1 + $0xbc4] ss:$16 sps:$4 sm:$0xff]  }
  0x6b   :  { %2534 = vmatpush2.bf16.msra.mxu0 %v4438_v48  ;;  %v4534_v48 = vld [vmem:[%s6540_s1 + $0x9c0] ss:$16 sps:$4 sm:$0xff]  }
  0x6c   :  { %2577 = vmatpush2.bf16.msra.mxu1 %v4441_v49  ;;  %2535 = vmatprep.subr.bf16.mxu0 %v4446_v50  ;;  %v4537_v49 = vld [vmem:[%s6540_s1 + $0xbc0] ss:$16 sps:$4 sm:$0xff]   ;;  %v4542_v50 = vld [vmem:[%s6540_s1 + $0x9a4] ss:$16 sps:$4 sm:$0xff]  }
  0x6d   :  { %2578 = vmatprep.subr.bf16.mxu1 %v4449_v51  ;;  %v4545_v51 = vld [vmem:[%s6540_s1 + $0xba4] ss:$16 sps:$4 sm:$0xff]  }
  0x6f   :  { %2536 = vmatpush2.bf16.msra.mxu0 %v4444_v52  ;;  %v4540_v52 = vld [vmem:[%s6540_s1 + $0x9a0] ss:$16 sps:$4 sm:$0xff]  }
  0x70   :  { %2579 = vmatpush2.bf16.msra.mxu1 %v4447_v53  ;;  %2537 = vmatprep.subr.bf16.mxu0 %v4452_v54  ;;  %v4543_v53 = vld [vmem:[%s6540_s1 + $0xba0] ss:$16 sps:$4 sm:$0xff]   ;;  %v4548_v54 = vld [vmem:[%s6540_s1 + $0x984] ss:$16 sps:$4 sm:$0xff]  }
  0x71   :  { %2580 = vmatprep.subr.bf16.mxu1 %v4455_v55  ;;  %v4551_v55 = vld [vmem:[%s6540_s1 + $0xb84] ss:$16 sps:$4 sm:$0xff]  }
  0x73   :  { %2538 = vmatpush2.bf16.msra.mxu0 %v4450_v56  ;;  %v4546_v56 = vld [vmem:[%s6540_s1 + $0x980] ss:$16 sps:$4 sm:$0xff]  }
  0x74   :  { %2581 = vmatpush2.bf16.msra.mxu1 %v4453_v57  ;;  %2539 = vmatprep.subr.bf16.mxu0 %v4458_v58  ;;  %v4549_v57 = vld [vmem:[%s6540_s1 + $0xb80] ss:$16 sps:$4 sm:$0xff]   ;;  %v4554_v58 = vld [vmem:[%s6540_s1 + $0x964] ss:$16 sps:$4 sm:$0xff]  }
  0x75   :  { %2582 = vmatprep.subr.bf16.mxu1 %v4461_v59  ;;  %v4557_v59 = vld [vmem:[%s6540_s1 + $0xb64] ss:$16 sps:$4 sm:$0xff]  }
  0x77   :  { %2540 = vmatpush2.bf16.msra.mxu0 %v4456_v60  ;;  %v4552_v60 = vld [vmem:[%s6540_s1 + $0x960] ss:$16 sps:$4 sm:$0xff]  }
  0x78   :  { %2583 = vmatpush2.bf16.msra.mxu1 %v4459_v61  ;;  %2541 = vmatprep.subr.bf16.mxu0 %v4464_v62  ;;  %v4555_v61 = vld [vmem:[%s6540_s1 + $0xb60] ss:$16 sps:$4 sm:$0xff]   ;;  %v4560_v62 = vld [vmem:[%s6540_s1 + $0x944] ss:$16 sps:$4 sm:$0xff]  }
  0x79   :  { %2584 = vmatprep.subr.bf16.mxu1 %v4467_v63  ;;  %v4563_v63 = vld [vmem:[%s6540_s1 + $0xb44] ss:$16 sps:$4 sm:$0xff]  }
  0x7b   :  { %2542 = vmatpush2.bf16.msra.mxu0 %v4462_v0  ;;  %v4558_v0 = vld [vmem:[%s6540_s1 + $0x940] ss:$16 sps:$4 sm:$0xff]  }
  0x7c   :  { %2585 = vmatpush2.bf16.msra.mxu1 %v4465_v1  ;;  %2543 = vmatprep.subr.bf16.mxu0 %v4470_v2  ;;  %v4561_v1 = vld [vmem:[%s6540_s1 + $0xb40] ss:$16 sps:$4 sm:$0xff]   ;;  %v4566_v2 = vld [vmem:[%s6540_s1 + $0x924] ss:$16 sps:$4 sm:$0xff]  }
  0x7d   :  { %2586 = vmatprep.subr.bf16.mxu1 %v4473_v3  ;;  %v4569_v3 = vld [vmem:[%s6540_s1 + $0xb24] ss:$16 sps:$4 sm:$0xff]  }
  0x7f   :  { %2544 = vmatpush2.bf16.msra.mxu0 %v4468_v4  ;;  %v4564_v4 = vld [vmem:[%s6540_s1 + $0x920] ss:$16 sps:$4 sm:$0xff]  }
  0x80   :  { %2587 = vmatpush2.bf16.msra.mxu1 %v4471_v5  ;;  %2599 = vmatprep.subr.bf16.mxu0 %v4482_v6  ;;  %v4567_v5 = vld [vmem:[%s6540_s1 + $0xb20] ss:$16 sps:$4 sm:$0xff]   ;;  %v4572_v6 = vld [vmem:[%s6540_s1 + $0x904] ss:$16 sps:$4 sm:$0xff]  }
  0x81   :  { %2642 = vmatprep.subr.bf16.mxu1 %v4485_v7  ;;  %v4575_v7 = vld [vmem:[%s6540_s1 + $0xb04] ss:$16 sps:$4 sm:$0xff]  }
  0x82   :  { %2546 = vmatmul.mubr.bf16.vlgmr.msra.gmra.mxu0 %v4474_v8  ;;  %v4570_v8 = vld [vmem:[%s6540_s1 + $0x900] ss:$16 sps:$4 sm:$0xff]  }
  0x83   :  { %2589 = vmatmul.mubr.bf16.vlgmr.msra.gmra.mxu1 %v4477_v9  ;;  %2600 = vmatpush1.bf16.msra.mxu0 %v4480_v10  ;;  %v4573_v9 = vld [vmem:[%s6540_s1 + $0xb00] ss:$16 sps:$4 sm:$0xff]   ;;  %v4584_v10 = vld [vmem:[%s6540_s1 + $0xec] ss:$16 sps:$4 sm:$0xff]  }
  0x84   :  { %2643 = vmatpush1.bf16.msra.mxu1 %v4483_v11  ;;  %2601 = vmatprep.subr.bf16.mxu0 %v4488_v12  ;;  %v4587_v11 = vld [vmem:[%s6540_s1 + $0x2ec] ss:$16 sps:$4 sm:$0xff]   ;;  %v5629_v12 = vld [vmem:[%s6541_s0 + $0x20] ss:$48 sps:$4 sm:$0xff]  }
  0x85   :  { %2644 = vmatprep.subr.bf16.mxu1 %v4491_v13  ;;  %2631 = vmatprep.mubr.bf16.mxu0 %v4578_v19  ;;  %v5634_v13 = vld [vmem:[%s6541_s0 + $0x28] ss:$48 sps:$4 sm:$0xff]  }
  0x86   :  { %2674 = vmatprep.mubr.bf16.mxu1 %v4581_v21  ;;  %v4591_v19 = vld [vmem:[%s6540_s1 + $0x2c8] ss:$16 sps:$4 sm:$0xff]   ;;  %v4599_v21 = vld [vmem:[%s6540_s1 + $0x2ac] ss:$16 sps:$4 sm:$0xff]  }
  0x87   :  { %2602 = vmatpush1.bf16.msra.mxu0 %v4486_v14  ;;  %v4582_v14 = vld [vmem:[%s6540_s1 + $0xe8] ss:$16 sps:$4 sm:$0xff]  }
  0x88   :  { %2645 = vmatpush1.bf16.msra.mxu1 %v4489_v15  ;;  %2603 = vmatprep.subr.bf16.mxu0 %v4494_v16  ;;  %v4585_v15 = vld [vmem:[%s6540_s1 + $0x2e8] ss:$16 sps:$4 sm:$0xff]   ;;  %v4590_v16 = vld [vmem:[%s6540_s1 + $0xcc] ss:$16 sps:$4 sm:$0xff]  }
  0x89   :  { %2646 = vmatprep.subr.bf16.mxu1 %v4497_v17  ;;  %v4593_v17 = vld [vmem:[%s6540_s1 + $0x2cc] ss:$16 sps:$4 sm:$0xff]  }
  0x8b   :  { %2604 = vmatpush1.bf16.msra.mxu0 %v4492_v18  ;;  %v4588_v18 = vld [vmem:[%s6540_s1 + $0xc8] ss:$16 sps:$4 sm:$0xff]  }
  0x8c   :  { %2647 = vmatpush1.bf16.msra.mxu1 %v4495_v20  ;;  %2605 = vmatprep.subr.bf16.mxu0 %v4500_v22  ;;  %v4596_v20 = vld [vmem:[%s6540_s1 + $0xac] ss:$16 sps:$4 sm:$0xff]   ;;  %v4958_v22 = vld [vmem:[%s6541_s0 + $0x4] ss:$48 sps:$4 sm:$0xff]  }
  0x8d   :  { %2648 = vmatprep.subr.bf16.mxu1 %v4503_v23  ;;  %v4959_v23 = vld [vmem:[%s6541_s0 + $0xc] ss:$48 sps:$4 sm:$0xff]  }
  0x8f   :  { %2606 = vmatpush1.bf16.msra.mxu0 %v4498_v24  ;;  %v4594_v24 = vld [vmem:[%s6540_s1 + $0xa8] ss:$16 sps:$4 sm:$0xff]  }
  0x90   :  { %2649 = vmatpush1.bf16.msra.mxu1 %v4501_v25  ;;  %2607 = vmatprep.subr.bf16.mxu0 %v4506_v26  ;;  %v4597_v25 = vld [vmem:[%s6540_s1 + $0x2a8] ss:$16 sps:$4 sm:$0xff]   ;;  %v4602_v26 = vld [vmem:[%s6540_s1 + $0x8c] ss:$16 sps:$4 sm:$0xff]  }
  0x91   :  { %2650 = vmatprep.subr.bf16.mxu1 %v4509_v27  ;;  %v4605_v27 = vld [vmem:[%s6540_s1 + $0x28c] ss:$16 sps:$4 sm:$0xff]  }
  0x93   :  { %2608 = vmatpush1.bf16.msra.mxu0 %v4504_v28  ;;  %v4600_v28 = vld [vmem:[%s6540_s1 + $0x88] ss:$16 sps:$4 sm:$0xff]  }
  0x94   :  { %2651 = vmatpush1.bf16.msra.mxu1 %v4507_v29  ;;  %2609 = vmatprep.subr.bf16.mxu0 %v4512_v30  ;;  %v4603_v29 = vld [vmem:[%s6540_s1 + $0x288] ss:$16 sps:$4 sm:$0xff]   ;;  %v4608_v30 = vld [vmem:[%s6540_s1 + $0x6c] ss:$16 sps:$4 sm:$0xff]  }
  0x95   :  { %2652 = vmatprep.subr.bf16.mxu1 %v4515_v31  ;;  %v4611_v31 = vld [vmem:[%s6540_s1 + $0x26c] ss:$16 sps:$4 sm:$0xff]  }
  0x97   :  { %2610 = vmatpush1.bf16.msra.mxu0 %v4510_v32  ;;  %v4606_v32 = vld [vmem:[%s6540_s1 + $0x68] ss:$16 sps:$4 sm:$0xff]  }
  0x98   :  { %2653 = vmatpush1.bf16.msra.mxu1 %v4513_v33  ;;  %2611 = vmatprep.subr.bf16.mxu0 %v4518_v34  ;;  %v4609_v33 = vld [vmem:[%s6540_s1 + $0x268] ss:$16 sps:$4 sm:$0xff]   ;;  %v4614_v34 = vld [vmem:[%s6540_s1 + $0x4c] ss:$16 sps:$4 sm:$0xff]  }
  0x99   :  { %2654 = vmatprep.subr.bf16.mxu1 %v4521_v35  ;;  %v4617_v35 = vld [vmem:[%s6540_s1 + $0x24c] ss:$16 sps:$4 sm:$0xff]  }
  0x9b   :  { %2612 = vmatpush1.bf16.msra.mxu0 %v4516_v36  ;;  %v4612_v36 = vld [vmem:[%s6540_s1 + $0x48] ss:$16 sps:$4 sm:$0xff]  }
  0x9c   :  { %2655 = vmatpush1.bf16.msra.mxu1 %v4519_v37  ;;  %2613 = vmatprep.subr.bf16.mxu0 %v4524_v38  ;;  %v4615_v37 = vld [vmem:[%s6540_s1 + $0x248] ss:$16 sps:$4 sm:$0xff]   ;;  %v4620_v38 = vld [vmem:[%s6540_s1 + $0x2c] ss:$16 sps:$4 sm:$0xff]  }
  0x9d   :  { %2656 = vmatprep.subr.bf16.mxu1 %v4527_v39  ;;  %v4623_v39 = vld [vmem:[%s6540_s1 + $0x22c] ss:$16 sps:$4 sm:$0xff]  }
  0x9f   :  { %2614 = vmatpush1.bf16.msra.mxu0 %v4522_v40  ;;  %v4618_v40 = vld [vmem:[%s6540_s1 + $0x28] ss:$16 sps:$4 sm:$0xff]  }
  0xa0   :  { %2657 = vmatpush1.bf16.msra.mxu1 %v4525_v41  ;;  %2615 = vmatprep.subr.bf16.mxu0 %v4530_v42  ;;  %v4621_v41 = vld [vmem:[%s6540_s1 + $0x228] ss:$16 sps:$4 sm:$0xff]   ;;  %v4626_v42 = vld [vmem:[%s6540_s1 + $0xc] ss:$16 sps:$4 sm:$0xff]  }
  0xa1   :  { %2658 = vmatprep.subr.bf16.mxu1 %v4533_v43  ;;  %v4629_v43 = vld [vmem:[%s6540_s1 + $0x20c] ss:$16 sps:$4 sm:$0xff]  }
  0xa3   :  { %2616 = vmatpush2.bf16.msra.mxu0 %v4528_v44  ;;  %v4624_v44 = vld [vmem:[%s6540_s1 + $0x8] ss:$16 sps:$4 sm:$0xff]  }
  0xa4   :  { %2659 = vmatpush2.bf16.msra.mxu1 %v4531_v45  ;;  %2617 = vmatprep.subr.bf16.mxu0 %v4536_v46  ;;  %v4627_v45 = vld [vmem:[%s6540_s1 + $0x208] ss:$16 sps:$4 sm:$0xff]   ;;  %v4632_v46 = vld [vmem:[%s6540_s1 + $0x1ec] ss:$16 sps:$4 sm:$0xff]  }
  0xa5   :  { %2660 = vmatprep.subr.bf16.mxu1 %v4539_v47  ;;  %v4635_v47 = vld [vmem:[%s6540_s1 + $0x3ec] ss:$16 sps:$4 sm:$0xff]  }
  0xa7   :  { %2618 = vmatpush2.bf16.msra.mxu0 %v4534_v48  ;;  %v4630_v48 = vld [vmem:[%s6540_s1 + $0x1e8] ss:$16 sps:$4 sm:$0xff]  }
  0xa8   :  { %2661 = vmatpush2.bf16.msra.mxu1 %v4537_v49  ;;  %2619 = vmatprep.subr.bf16.mxu0 %v4542_v50  ;;  %v4633_v49 = vld [vmem:[%s6540_s1 + $0x3e8] ss:$16 sps:$4 sm:$0xff]   ;;  %v4638_v50 = vld [vmem:[%s6540_s1 + $0x1cc] ss:$16 sps:$4 sm:$0xff]  }
  0xa9   :  { %2662 = vmatprep.subr.bf16.mxu1 %v4545_v51  ;;  %v4641_v51 = vld [vmem:[%s6540_s1 + $0x3cc] ss:$16 sps:$4 sm:$0xff]  }
  0xab   :  { %2620 = vmatpush2.bf16.msra.mxu0 %v4540_v52  ;;  %v4636_v52 = vld [vmem:[%s6540_s1 + $0x1c8] ss:$16 sps:$4 sm:$0xff]  }
  0xac   :  { %2663 = vmatpush2.bf16.msra.mxu1 %v4543_v53  ;;  %2621 = vmatprep.subr.bf16.mxu0 %v4548_v54  ;;  %v4639_v53 = vld [vmem:[%s6540_s1 + $0x3c8] ss:$16 sps:$4 sm:$0xff]   ;;  %v4644_v54 = vld [vmem:[%s6540_s1 + $0x1ac] ss:$16 sps:$4 sm:$0xff]  }
  0xad   :  { %2664 = vmatprep.subr.bf16.mxu1 %v4551_v55  ;;  %v4647_v55 = vld [vmem:[%s6540_s1 + $0x3ac] ss:$16 sps:$4 sm:$0xff]  }
  0xaf   :  { %2622 = vmatpush2.bf16.msra.mxu0 %v4546_v56  ;;  %v4642_v56 = vld [vmem:[%s6540_s1 + $0x1a8] ss:$16 sps:$4 sm:$0xff]  }
  0xb0   :  { %2665 = vmatpush2.bf16.msra.mxu1 %v4549_v57  ;;  %2623 = vmatprep.subr.bf16.mxu0 %v4554_v58  ;;  %v4645_v57 = vld [vmem:[%s6540_s1 + $0x3a8] ss:$16 sps:$4 sm:$0xff]   ;;  %v4650_v58 = vld [vmem:[%s6540_s1 + $0x18c] ss:$16 sps:$4 sm:$0xff]  }
  0xb1   :  { %2666 = vmatprep.subr.bf16.mxu1 %v4557_v59  ;;  %v4653_v59 = vld [vmem:[%s6540_s1 + $0x38c] ss:$16 sps:$4 sm:$0xff]  }
  0xb3   :  { %2624 = vmatpush2.bf16.msra.mxu0 %v4552_v60  ;;  %v4648_v60 = vld [vmem:[%s6540_s1 + $0x188] ss:$16 sps:$4 sm:$0xff]  }
  0xb4   :  { %2667 = vmatpush2.bf16.msra.mxu1 %v4555_v61  ;;  %2625 = vmatprep.subr.bf16.mxu0 %v4560_v62  ;;  %v4651_v61 = vld [vmem:[%s6540_s1 + $0x388] ss:$16 sps:$4 sm:$0xff]   ;;  %v4656_v62 = vld [vmem:[%s6540_s1 + $0x16c] ss:$16 sps:$4 sm:$0xff]  }
  0xb5   :  { %2668 = vmatprep.subr.bf16.mxu1 %v4563_v63  ;;  %v4659_v63 = vld [vmem:[%s6540_s1 + $0x36c] ss:$16 sps:$4 sm:$0xff]  }
  0xb7   :  { %2626 = vmatpush2.bf16.msra.mxu0 %v4558_v0  ;;  %v4654_v0 = vld [vmem:[%s6540_s1 + $0x168] ss:$16 sps:$4 sm:$0xff]  }
  0xb8   :  { %2669 = vmatpush2.bf16.msra.mxu1 %v4561_v1  ;;  %2627 = vmatprep.subr.bf16.mxu0 %v4566_v2  ;;  %v4657_v1 = vld [vmem:[%s6540_s1 + $0x368] ss:$16 sps:$4 sm:$0xff]   ;;  %v4662_v2 = vld [vmem:[%s6540_s1 + $0x14c] ss:$16 sps:$4 sm:$0xff]  }
  0xb9   :  { %2670 = vmatprep.subr.bf16.mxu1 %v4569_v3  ;;  %v4665_v3 = vld [vmem:[%s6540_s1 + $0x34c] ss:$16 sps:$4 sm:$0xff]  }
  0xbb   :  { %2628 = vmatpush2.bf16.msra.mxu0 %v4564_v4  ;;  %v4660_v4 = vld [vmem:[%s6540_s1 + $0x148] ss:$16 sps:$4 sm:$0xff]  }
  0xbc   :  { %2671 = vmatpush2.bf16.msra.mxu1 %v4567_v5  ;;  %2629 = vmatprep.subr.bf16.mxu0 %v4572_v6  ;;  %v4663_v5 = vld [vmem:[%s6540_s1 + $0x348] ss:$16 sps:$4 sm:$0xff]   ;;  %v4668_v6 = vld [vmem:[%s6540_s1 + $0x12c] ss:$16 sps:$4 sm:$0xff]  }
  0xbd   :  { %2672 = vmatprep.subr.bf16.mxu1 %v4575_v7  ;;  %v4671_v7 = vld [vmem:[%s6540_s1 + $0x32c] ss:$16 sps:$4 sm:$0xff]  }
  0xbf   :  { %2630 = vmatpush2.bf16.msra.mxu0 %v4570_v8  ;;  %v4666_v8 = vld [vmem:[%s6540_s1 + $0x128] ss:$16 sps:$4 sm:$0xff]  }
  0xc0   :  { %2673 = vmatpush2.bf16.msra.mxu1 %v4573_v9  ;;  %2685 = vmatprep.subr.bf16.mxu0 %v4584_v10  ;;  %v4669_v9 = vld [vmem:[%s6540_s1 + $0x328] ss:$16 sps:$4 sm:$0xff]   ;;  %v4674_v10 = vld [vmem:[%s6540_s1 + $0x10c] ss:$16 sps:$4 sm:$0xff]  }
  0xc1   :  { %2728 = vmatprep.subr.bf16.mxu1 %v4587_v11  ;;  %v4677_v11 = vld [vmem:[%s6540_s1 + $0x30c] ss:$16 sps:$4 sm:$0xff]  }
  0xc2   :  { %2632 = vmatmul.mubr.bf16.vlgmr.msra.gmra.mxu0 %v5629_v12 }
  0xc3   :  { %2675 = vmatmul.mubr.bf16.vlgmr.msra.gmra.mxu1 %v5634_v13  ;;  %2686 = vmatpush1.bf16.msra.mxu0 %v4582_v14  ;;  %v4672_v14 = vld [vmem:[%s6540_s1 + $0x108] ss:$16 sps:$4 sm:$0xff]  }
  0xc4   :  { %2729 = vmatpush1.bf16.msra.mxu1 %v4585_v15  ;;  %2687 = vmatprep.subr.bf16.mxu0 %v4590_v16  ;;  %v4675_v15 = vld [vmem:[%s6540_s1 + $0x308] ss:$16 sps:$4 sm:$0xff]   ;;  %v4680_v16 = vld [vmem:[%s6540_s1 + $0x4ec] ss:$16 sps:$4 sm:$0xff]  }
  0xc5   :  { %2730 = vmatprep.subr.bf16.mxu1 %v4593_v17  ;;  %2717 = vmatprep.mubr.bf16.mxu0 %v4958_v22  ;;  %v4683_v17 = vld [vmem:[%s6540_s1 + $0x6ec] ss:$16 sps:$4 sm:$0xff]   ;;  %v4960_v22 = vld [vmem:[%s6541_s0] ss:$48 sps:$4 sm:$0xff]  }
  0xc6   :  { %2760 = vmatprep.mubr.bf16.mxu1 %v4959_v23  ;;  %v4961_v23 = vld [vmem:[%s6541_s0 + $0x8] ss:$48 sps:$4 sm:$0xff]  }
  0xc7   :  { %2688 = vmatpush1.bf16.msra.mxu0 %v4588_v18  ;;  %v4678_v18 = vld [vmem:[%s6540_s1 + $0x4e8] ss:$16 sps:$4 sm:$0xff]  }
  0xc8   :  { %2731 = vmatpush1.bf16.msra.mxu1 %v4591_v19  ;;  %2689 = vmatprep.subr.bf16.mxu0 %v4596_v20  ;;  %v4681_v19 = vld [vmem:[%s6540_s1 + $0x6e8] ss:$16 sps:$4 sm:$0xff]   ;;  %v4686_v20 = vld [vmem:[%s6540_s1 + $0x4cc] ss:$16 sps:$4 sm:$0xff]  }
  0xc9   :  { %2732 = vmatprep.subr.bf16.mxu1 %v4599_v21  ;;  %v4689_v21 = vld [vmem:[%s6540_s1 + $0x6cc] ss:$16 sps:$4 sm:$0xff]  }
  0xcb   :  { %2690 = vmatpush1.bf16.msra.mxu0 %v4594_v24  ;;  %v4684_v24 = vld [vmem:[%s6540_s1 + $0x4c8] ss:$16 sps:$4 sm:$0xff]  }
  0xcc   :  { %2733 = vmatpush1.bf16.msra.mxu1 %v4597_v25  ;;  %2691 = vmatprep.subr.bf16.mxu0 %v4602_v26  ;;  %v4687_v25 = vld [vmem:[%s6540_s1 + $0x6c8] ss:$16 sps:$4 sm:$0xff]   ;;  %v4692_v26 = vld [vmem:[%s6540_s1 + $0x4ac] ss:$16 sps:$4 sm:$0xff]  }
  0xcd   :  { %2734 = vmatprep.subr.bf16.mxu1 %v4605_v27  ;;  %v4695_v27 = vld [vmem:[%s6540_s1 + $0x6ac] ss:$16 sps:$4 sm:$0xff]  }
  0xcf   :  { %2692 = vmatpush1.bf16.msra.mxu0 %v4600_v28  ;;  %v4962_v28 = vld [vmem:[%s6541_s0 + $0x14] ss:$48 sps:$4 sm:$0xff]  }
  0xd0   :  { %2735 = vmatpush1.bf16.msra.mxu1 %v4603_v29  ;;  %2693 = vmatprep.subr.bf16.mxu0 %v4608_v30  ;;  %v4963_v29 = vld [vmem:[%s6541_s0 + $0x1c] ss:$48 sps:$4 sm:$0xff]   ;;  %v4690_v30 = vld [vmem:[%s6540_s1 + $0x4a8] ss:$16 sps:$4 sm:$0xff]  }
  0xd1   :  { %2736 = vmatprep.subr.bf16.mxu1 %v4611_v31  ;;  %v4693_v31 = vld [vmem:[%s6540_s1 + $0x6a8] ss:$16 sps:$4 sm:$0xff]  }
  0xd3   :  { %2694 = vmatpush1.bf16.msra.mxu0 %v4606_v32  ;;  %v4698_v32 = vld [vmem:[%s6540_s1 + $0x48c] ss:$16 sps:$4 sm:$0xff]  }
  0xd4   :  { %2737 = vmatpush1.bf16.msra.mxu1 %v4609_v33  ;;  %2695 = vmatprep.subr.bf16.mxu0 %v4614_v34  ;;  %v4701_v33 = vld [vmem:[%s6540_s1 + $0x68c] ss:$16 sps:$4 sm:$0xff]   ;;  %v4696_v34 = vld [vmem:[%s6540_s1 + $0x488] ss:$16 sps:$4 sm:$0xff]  }
  0xd5   :  { %2738 = vmatprep.subr.bf16.mxu1 %v4617_v35  ;;  %v4699_v35 = vld [vmem:[%s6540_s1 + $0x688] ss:$16 sps:$4 sm:$0xff]  }
  0xd7   :  { %2696 = vmatpush1.bf16.msra.mxu0 %v4612_v36  ;;  %v4704_v36 = vld [vmem:[%s6540_s1 + $0x46c] ss:$16 sps:$4 sm:$0xff]  }
  0xd8   :  { %2739 = vmatpush1.bf16.msra.mxu1 %v4615_v37  ;;  %2697 = vmatprep.subr.bf16.mxu0 %v4620_v38  ;;  %v4707_v37 = vld [vmem:[%s6540_s1 + $0x66c] ss:$16 sps:$4 sm:$0xff]   ;;  %v4702_v38 = vld [vmem:[%s6540_s1 + $0x468] ss:$16 sps:$4 sm:$0xff]  }
  0xd9   :  { %2740 = vmatprep.subr.bf16.mxu1 %v4623_v39  ;;  %v4705_v39 = vld [vmem:[%s6540_s1 + $0x668] ss:$16 sps:$4 sm:$0xff]  }
  0xdb   :  { %2698 = vmatpush1.bf16.msra.mxu0 %v4618_v40  ;;  %v4710_v40 = vld [vmem:[%s6540_s1 + $0x44c] ss:$16 sps:$4 sm:$0xff]  }
  0xdc   :  { %2741 = vmatpush1.bf16.msra.mxu1 %v4621_v41  ;;  %2699 = vmatprep.subr.bf16.mxu0 %v4626_v42  ;;  %v4713_v41 = vld [vmem:[%s6540_s1 + $0x64c] ss:$16 sps:$4 sm:$0xff]   ;;  %v4708_v42 = vld [vmem:[%s6540_s1 + $0x448] ss:$16 sps:$4 sm:$0xff]  }
  0xdd   :  { %2742 = vmatprep.subr.bf16.mxu1 %v4629_v43  ;;  %v4711_v43 = vld [vmem:[%s6540_s1 + $0x648] ss:$16 sps:$4 sm:$0xff]  }
  0xdf   :  { %2700 = vmatpush1.bf16.msra.mxu0 %v4624_v44  ;;  %v4716_v44 = vld [vmem:[%s6540_s1 + $0x42c] ss:$16 sps:$4 sm:$0xff]  }
  0xe0   :  { %2743 = vmatpush1.bf16.msra.mxu1 %v4627_v45  ;;  %2701 = vmatprep.subr.bf16.mxu0 %v4632_v46  ;;  %v4719_v45 = vld [vmem:[%s6540_s1 + $0x62c] ss:$16 sps:$4 sm:$0xff]   ;;  %v4714_v46 = vld [vmem:[%s6540_s1 + $0x428] ss:$16 sps:$4 sm:$0xff]  }
  0xe1   :  { %2744 = vmatprep.subr.bf16.mxu1 %v4635_v47  ;;  %v4717_v47 = vld [vmem:[%s6540_s1 + $0x628] ss:$16 sps:$4 sm:$0xff]  }
  0xe3   :  { %2702 = vmatpush2.bf16.msra.mxu0 %v4630_v48  ;;  %v4722_v48 = vld [vmem:[%s6540_s1 + $0x40c] ss:$16 sps:$4 sm:$0xff]  }
  0xe4   :  { %2745 = vmatpush2.bf16.msra.mxu1 %v4633_v49  ;;  %2703 = vmatprep.subr.bf16.mxu0 %v4638_v50  ;;  %v4725_v49 = vld [vmem:[%s6540_s1 + $0x60c] ss:$16 sps:$4 sm:$0xff]   ;;  %v4720_v50 = vld [vmem:[%s6540_s1 + $0x408] ss:$16 sps:$4 sm:$0xff]  }
  0xe5   :  { %2746 = vmatprep.subr.bf16.mxu1 %v4641_v51  ;;  %v4723_v51 = vld [vmem:[%s6540_s1 + $0x608] ss:$16 sps:$4 sm:$0xff]  }
  0xe7   :  { %2704 = vmatpush2.bf16.msra.mxu0 %v4636_v52  ;;  %v4728_v52 = vld [vmem:[%s6540_s1 + $0x5ec] ss:$16 sps:$4 sm:$0xff]  }
  0xe8   :  { %2747 = vmatpush2.bf16.msra.mxu1 %v4639_v53  ;;  %2705 = vmatprep.subr.bf16.mxu0 %v4644_v54  ;;  %v4731_v53 = vld [vmem:[%s6540_s1 + $0x7ec] ss:$16 sps:$4 sm:$0xff]   ;;  %v4726_v54 = vld [vmem:[%s6540_s1 + $0x5e8] ss:$16 sps:$4 sm:$0xff]  }
  0xe9   :  { %2748 = vmatprep.subr.bf16.mxu1 %v4647_v55  ;;  %v4729_v55 = vld [vmem:[%s6540_s1 + $0x7e8] ss:$16 sps:$4 sm:$0xff]  }
  0xeb   :  { %2706 = vmatpush2.bf16.msra.mxu0 %v4642_v56  ;;  %v4734_v56 = vld [vmem:[%s6540_s1 + $0x5cc] ss:$16 sps:$4 sm:$0xff]  }
  0xec   :  { %2749 = vmatpush2.bf16.msra.mxu1 %v4645_v57  ;;  %2707 = vmatprep.subr.bf16.mxu0 %v4650_v58  ;;  %v4737_v57 = vld [vmem:[%s6540_s1 + $0x7cc] ss:$16 sps:$4 sm:$0xff]   ;;  %v4732_v58 = vld [vmem:[%s6540_s1 + $0x5c8] ss:$16 sps:$4 sm:$0xff]  }
  0xed   :  { %2750 = vmatprep.subr.bf16.mxu1 %v4653_v59  ;;  %v4735_v59 = vld [vmem:[%s6540_s1 + $0x7c8] ss:$16 sps:$4 sm:$0xff]  }
  0xef   :  { %2708 = vmatpush2.bf16.msra.mxu0 %v4648_v60  ;;  %v4740_v60 = vld [vmem:[%s6540_s1 + $0x5ac] ss:$16 sps:$4 sm:$0xff]  }
  0xf0   :  { %2751 = vmatpush2.bf16.msra.mxu1 %v4651_v61  ;;  %2709 = vmatprep.subr.bf16.mxu0 %v4656_v62  ;;  %v4743_v61 = vld [vmem:[%s6540_s1 + $0x7ac] ss:$16 sps:$4 sm:$0xff]   ;;  %v4738_v62 = vld [vmem:[%s6540_s1 + $0x5a8] ss:$16 sps:$4 sm:$0xff]  }
  0xf1   :  { %2752 = vmatprep.subr.bf16.mxu1 %v4659_v63  ;;  %v4741_v63 = vld [vmem:[%s6540_s1 + $0x7a8] ss:$16 sps:$4 sm:$0xff]  }
  0xf3   :  { %2710 = vmatpush2.bf16.msra.mxu0 %v4654_v0  ;;  %v4746_v0 = vld [vmem:[%s6540_s1 + $0x58c] ss:$16 sps:$4 sm:$0xff]  }
  0xf4   :  { %2753 = vmatpush2.bf16.msra.mxu1 %v4657_v1  ;;  %2711 = vmatprep.subr.bf16.mxu0 %v4662_v2  ;;  %v4749_v1 = vld [vmem:[%s6540_s1 + $0x78c] ss:$16 sps:$4 sm:$0xff]   ;;  %v4744_v2 = vld [vmem:[%s6540_s1 + $0x588] ss:$16 sps:$4 sm:$0xff]  }
  0xf5   :  { %2754 = vmatprep.subr.bf16.mxu1 %v4665_v3  ;;  %v4747_v3 = vld [vmem:[%s6540_s1 + $0x788] ss:$16 sps:$4 sm:$0xff]  }
  0xf7   :  { %2712 = vmatpush2.bf16.msra.mxu0 %v4660_v4  ;;  %v4752_v4 = vld [vmem:[%s6540_s1 + $0x56c] ss:$16 sps:$4 sm:$0xff]  }
  0xf8   :  { %2755 = vmatpush2.bf16.msra.mxu1 %v4663_v5  ;;  %2713 = vmatprep.subr.bf16.mxu0 %v4668_v6  ;;  %v4755_v5 = vld [vmem:[%s6540_s1 + $0x76c] ss:$16 sps:$4 sm:$0xff]   ;;  %v4750_v6 = vld [vmem:[%s6540_s1 + $0x568] ss:$16 sps:$4 sm:$0xff]  }
  0xf9   :  { %2756 = vmatprep.subr.bf16.mxu1 %v4671_v7  ;;  %v4753_v7 = vld [vmem:[%s6540_s1 + $0x768] ss:$16 sps:$4 sm:$0xff]  }
  0xfb   :  { %2714 = vmatpush2.bf16.msra.mxu0 %v4666_v8  ;;  %v4758_v8 = vld [vmem:[%s6540_s1 + $0x54c] ss:$16 sps:$4 sm:$0xff]  }
  0xfc   :  { %2757 = vmatpush2.bf16.msra.mxu1 %v4669_v9  ;;  %2715 = vmatprep.subr.bf16.mxu0 %v4674_v10  ;;  %v4761_v9 = vld [vmem:[%s6540_s1 + $0x74c] ss:$16 sps:$4 sm:$0xff]   ;;  %v4756_v10 = vld [vmem:[%s6540_s1 + $0x548] ss:$16 sps:$4 sm:$0xff]  }
  0xfd   :  { %2758 = vmatprep.subr.bf16.mxu1 %v4677_v11  ;;  %v4759_v11 = vld [vmem:[%s6540_s1 + $0x748] ss:$16 sps:$4 sm:$0xff]  }
  0xff   :  { %2716 = vmatpush2.bf16.msra.mxu0 %v4672_v14  ;;  %v4764_v14 = vld [vmem:[%s6540_s1 + $0x52c] ss:$16 sps:$4 sm:$0xff]  }
 0x100   :  { %2759 = vmatpush2.bf16.msra.mxu1 %v4675_v15  ;;  %2771 = vmatprep.subr.bf16.mxu0 %v4680_v16  ;;  %v4767_v15 = vld [vmem:[%s6540_s1 + $0x72c] ss:$16 sps:$4 sm:$0xff]   ;;  %v4762_v16 = vld [vmem:[%s6540_s1 + $0x528] ss:$16 sps:$4 sm:$0xff]  }
 0x101   :  { %2814 = vmatprep.subr.bf16.mxu1 %v4683_v17  ;;  %v4765_v17 = vld [vmem:[%s6540_s1 + $0x728] ss:$16 sps:$4 sm:$0xff]  }
 0x102   :  { %2718 = vmatmul.mubr.bf16.vlgmr.msra.gmra.mxu0 %v4960_v22  ;;  %v4776_v22 = vld [vmem:[%s6540_s1 + $0x8ec] ss:$16 sps:$4 sm:$0xff]  }
 0x103   :  { %2761 = vmatmul.mubr.bf16.vlgmr.msra.gmra.mxu1 %v4961_v23  ;;  %2772 = vmatpush1.bf16.msra.mxu0 %v4678_v18  ;;  %v4770_v18 = vld [vmem:[%s6540_s1 + $0x50c] ss:$16 sps:$4 sm:$0xff]  }
 0x104   :  { %2815 = vmatpush1.bf16.msra.mxu1 %v4681_v19  ;;  %2773 = vmatprep.subr.bf16.mxu0 %v4686_v20  ;;  %v4773_v19 = vld [vmem:[%s6540_s1 + $0x70c] ss:$16 sps:$4 sm:$0xff]   ;;  %v4768_v20 = vld [vmem:[%s6540_s1 + $0x508] ss:$16 sps:$4 sm:$0xff]  }
 0x105   :  { %2816 = vmatprep.subr.bf16.mxu1 %v4689_v21  ;;  %2803 = vmatprep.mubr.bf16.mxu0 %v4962_v28  ;;  %v4771_v21 = vld [vmem:[%s6540_s1 + $0x708] ss:$16 sps:$4 sm:$0xff]   ;;  %v4779_v23 = vld [vmem:[%s6540_s1 + $0xaec] ss:$16 sps:$4 sm:$0xff]   ;;  %v6055_v28 = vld [vmem:[%s6541_s0 + $0x10] ss:$48 sps:$4 sm:$0xff]  }
 0x106   :  { %2846 = vmatprep.mubr.bf16.mxu1 %v4963_v29  ;;  %v6061_v29 = vld [vmem:[%s6541_s0 + $0x18] ss:$48 sps:$4 sm:$0xff]  }
 0x107   :  { %2774 = vmatpush1.bf16.msra.mxu0 %v4684_v24  ;;  %v4774_v24 = vld [vmem:[%s6540_s1 + $0x8e8] ss:$16 sps:$4 sm:$0xff]  }
 0x108   :  { %2817 = vmatpush1.bf16.msra.mxu1 %v4687_v25  ;;  %2775 = vmatprep.subr.bf16.mxu0 %v4692_v26  ;;  %v4777_v25 = vld [vmem:[%s6540_s1 + $0xae8] ss:$16 sps:$4 sm:$0xff]   ;;  %v4782_v26 = vld [vmem:[%s6540_s1 + $0x8cc] ss:$16 sps:$4 sm:$0xff]  }
 0x109   :  { %2818 = vmatprep.subr.bf16.mxu1 %v4695_v27  ;;  %v4785_v27 = vld [vmem:[%s6540_s1 + $0xacc] ss:$16 sps:$4 sm:$0xff]  }
 0x10b   :  { %2776 = vmatpush1.bf16.msra.mxu0 %v4690_v30  ;;  %v4780_v30 = vld [vmem:[%s6540_s1 + $0x8c8] ss:$16 sps:$4 sm:$0xff]  }
 0x10c   :  { %2819 = vmatpush1.bf16.msra.mxu1 %v4693_v31  ;;  %2777 = vmatprep.subr.bf16.mxu0 %v4698_v32  ;;  %v4783_v31 = vld [vmem:[%s6540_s1 + $0xac8] ss:$16 sps:$4 sm:$0xff]   ;;  %v4788_v32 = vld [vmem:[%s6540_s1 + $0x8ac] ss:$16 sps:$4 sm:$0xff]  }
 0x10d   :  { %2820 = vmatprep.subr.bf16.mxu1 %v4701_v33  ;;  %v4791_v33 = vld [vmem:[%s6540_s1 + $0xaac] ss:$16 sps:$4 sm:$0xff]  }
 0x10f   :  { %2778 = vmatpush1.bf16.msra.mxu0 %v4696_v34  ;;  %v4966_v34 = vld [vmem:[%s6541_s0 + $0x24] ss:$48 sps:$4 sm:$0xff]  }
 0x110   :  { %2821 = vmatpush1.bf16.msra.mxu1 %v4699_v35  ;;  %2779 = vmatprep.subr.bf16.mxu0 %v4704_v36  ;;  %v4967_v35 = vld [vmem:[%s6541_s0 + $0x2c] ss:$48 sps:$4 sm:$0xff]   ;;  %v4786_v36 = vld [vmem:[%s6540_s1 + $0x8a8] ss:$16 sps:$4 sm:$0xff]  }
 0x111   :  { %2822 = vmatprep.subr.bf16.mxu1 %v4707_v37  ;;  %v4789_v37 = vld [vmem:[%s6540_s1 + $0xaa8] ss:$16 sps:$4 sm:$0xff]  }
 0x113   :  { %2780 = vmatpush1.bf16.msra.mxu0 %v4702_v38  ;;  %v4794_v38 = vld [vmem:[%s6540_s1 + $0x88c] ss:$16 sps:$4 sm:$0xff]  }
 0x114   :  { %2823 = vmatpush1.bf16.msra.mxu1 %v4705_v39  ;;  %2781 = vmatprep.subr.bf16.mxu0 %v4710_v40  ;;  %v4797_v39 = vld [vmem:[%s6540_s1 + $0xa8c] ss:$16 sps:$4 sm:$0xff]   ;;  %v4792_v40 = vld [vmem:[%s6540_s1 + $0x888] ss:$16 sps:$4 sm:$0xff]  }
 0x115   :  { %2824 = vmatprep.subr.bf16.mxu1 %v4713_v41  ;;  %v4795_v41 = vld [vmem:[%s6540_s1 + $0xa88] ss:$16 sps:$4 sm:$0xff]  }
 0x117   :  { %2782 = vmatpush1.bf16.msra.mxu0 %v4708_v42  ;;  %v4800_v42 = vld [vmem:[%s6540_s1 + $0x86c] ss:$16 sps:$4 sm:$0xff]  }
 0x118   :  { %2825 = vmatpush1.bf16.msra.mxu1 %v4711_v43  ;;  %2783 = vmatprep.subr.bf16.mxu0 %v4716_v44  ;;  %v4803_v43 = vld [vmem:[%s6540_s1 + $0xa6c] ss:$16 sps:$4 sm:$0xff]   ;;  %v4798_v44 = vld [vmem:[%s6540_s1 + $0x868] ss:$16 sps:$4 sm:$0xff]  }
 0x119   :  { %2826 = vmatprep.subr.bf16.mxu1 %v4719_v45  ;;  %v4801_v45 = vld [vmem:[%s6540_s1 + $0xa68] ss:$16 sps:$4 sm:$0xff]  }
 0x11b   :  { %2784 = vmatpush1.bf16.msra.mxu0 %v4714_v46  ;;  %v4806_v46 = vld [vmem:[%s6540_s1 + $0x84c] ss:$16 sps:$4 sm:$0xff]  }
 0x11c   :  { %2827 = vmatpush1.bf16.msra.mxu1 %v4717_v47  ;;  %2785 = vmatprep.subr.bf16.mxu0 %v4722_v48  ;;  %v4809_v47 = vld [vmem:[%s6540_s1 + $0xa4c] ss:$16 sps:$4 sm:$0xff]   ;;  %v4804_v48 = vld [vmem:[%s6540_s1 + $0x848] ss:$16 sps:$4 sm:$0xff]  }
 0x11d   :  { %2828 = vmatprep.subr.bf16.mxu1 %v4725_v49  ;;  %v4807_v49 = vld [vmem:[%s6540_s1 + $0xa48] ss:$16 sps:$4 sm:$0xff]  }
 0x11f   :  { %2786 = vmatpush1.bf16.msra.mxu0 %v4720_v50  ;;  %v4812_v50 = vld [vmem:[%s6540_s1 + $0x82c] ss:$16 sps:$4 sm:$0xff]  }
 0x120   :  { %2829 = vmatpush1.bf16.msra.mxu1 %v4723_v51  ;;  %2787 = vmatprep.subr.bf16.mxu0 %v4728_v52  ;;  %v4815_v51 = vld [vmem:[%s6540_s1 + $0xa2c] ss:$16 sps:$4 sm:$0xff]   ;;  %v4810_v52 = vld [vmem:[%s6540_s1 + $0x828] ss:$16 sps:$4 sm:$0xff]  }
 0x121   :  { %2830 = vmatprep.subr.bf16.mxu1 %v4731_v53  ;;  %v4813_v53 = vld [vmem:[%s6540_s1 + $0xa28] ss:$16 sps:$4 sm:$0xff]  }
 0x123   :  { %2788 = vmatpush2.bf16.msra.mxu0 %v4726_v54  ;;  %v4818_v54 = vld [vmem:[%s6540_s1 + $0x80c] ss:$16 sps:$4 sm:$0xff]  }
 0x124   :  { %2831 = vmatpush2.bf16.msra.mxu1 %v4729_v55  ;;  %2789 = vmatprep.subr.bf16.mxu0 %v4734_v56  ;;  %v4821_v55 = vld [vmem:[%s6540_s1 + $0xa0c] ss:$16 sps:$4 sm:$0xff]   ;;  %v4816_v56 = vld [vmem:[%s6540_s1 + $0x808] ss:$16 sps:$4 sm:$0xff]  }
 0x125   :  { %2832 = vmatprep.subr.bf16.mxu1 %v4737_v57  ;;  %v4819_v57 = vld [vmem:[%s6540_s1 + $0xa08] ss:$16 sps:$4 sm:$0xff]  }
 0x127   :  { %2790 = vmatpush2.bf16.msra.mxu0 %v4732_v58  ;;  %v4824_v58 = vld [vmem:[%s6540_s1 + $0x9ec] ss:$16 sps:$4 sm:$0xff]  }
 0x128   :  { %2833 = vmatpush2.bf16.msra.mxu1 %v4735_v59  ;;  %2791 = vmatprep.subr.bf16.mxu0 %v4740_v60  ;;  %v4827_v59 = vld [vmem:[%s6540_s1 + $0xbec] ss:$16 sps:$4 sm:$0xff]   ;;  %v4822_v60 = vld [vmem:[%s6540_s1 + $0x9e8] ss:$16 sps:$4 sm:$0xff]  }
 0x129   :  { %2834 = vmatprep.subr.bf16.mxu1 %v4743_v61  ;;  %v4825_v61 = vld [vmem:[%s6540_s1 + $0xbe8] ss:$16 sps:$4 sm:$0xff]  }
 0x12b   :  { %2792 = vmatpush2.bf16.msra.mxu0 %v4738_v62  ;;  %v4830_v62 = vld [vmem:[%s6540_s1 + $0x9cc] ss:$16 sps:$4 sm:$0xff]  }
 0x12c   :  { %2835 = vmatpush2.bf16.msra.mxu1 %v4741_v63  ;;  %2793 = vmatprep.subr.bf16.mxu0 %v4746_v0  ;;  %v4833_v63 = vld [vmem:[%s6540_s1 + $0xbcc] ss:$16 sps:$4 sm:$0xff]   ;;  %v4828_v0 = vld [vmem:[%s6540_s1 + $0x9c8] ss:$16 sps:$4 sm:$0xff]  }
 0x12d   :  { %2836 = vmatprep.subr.bf16.mxu1 %v4749_v1  ;;  %v4831_v1 = vld [vmem:[%s6540_s1 + $0xbc8] ss:$16 sps:$4 sm:$0xff]  }
 0x12f   :  { %2794 = vmatpush2.bf16.msra.mxu0 %v4744_v2  ;;  %v4836_v2 = vld [vmem:[%s6540_s1 + $0x9ac] ss:$16 sps:$4 sm:$0xff]  }
 0x130   :  { %2837 = vmatpush2.bf16.msra.mxu1 %v4747_v3  ;;  %2795 = vmatprep.subr.bf16.mxu0 %v4752_v4  ;;  %v4839_v3 = vld [vmem:[%s6540_s1 + $0xbac] ss:$16 sps:$4 sm:$0xff]   ;;  %v4834_v4 = vld [vmem:[%s6540_s1 + $0x9a8] ss:$16 sps:$4 sm:$0xff]  }
 0x131   :  { %2838 = vmatprep.subr.bf16.mxu1 %v4755_v5  ;;  %v4837_v5 = vld [vmem:[%s6540_s1 + $0xba8] ss:$16 sps:$4 sm:$0xff]  }
 0x133   :  { %2796 = vmatpush2.bf16.msra.mxu0 %v4750_v6  ;;  %v4842_v6 = vld [vmem:[%s6540_s1 + $0x98c] ss:$16 sps:$4 sm:$0xff]  }
 0x134   :  { %2839 = vmatpush2.bf16.msra.mxu1 %v4753_v7  ;;  %2797 = vmatprep.subr.bf16.mxu0 %v4758_v8  ;;  %v4845_v7 = vld [vmem:[%s6540_s1 + $0xb8c] ss:$16 sps:$4 sm:$0xff]   ;;  %v4840_v8 = vld [vmem:[%s6540_s1 + $0x988] ss:$16 sps:$4 sm:$0xff]  }
 0x135   :  { %2840 = vmatprep.subr.bf16.mxu1 %v4761_v9  ;;  %v4843_v9 = vld [vmem:[%s6540_s1 + $0xb88] ss:$16 sps:$4 sm:$0xff]  }
 0x137   :  { %2798 = vmatpush2.bf16.msra.mxu0 %v4756_v10  ;;  %v4848_v10 = vld [vmem:[%s6540_s1 + $0x96c] ss:$16 sps:$4 sm:$0xff]  }
 0x138   :  { %2841 = vmatpush2.bf16.msra.mxu1 %v4759_v11  ;;  %2799 = vmatprep.subr.bf16.mxu0 %v4764_v14  ;;  %v4851_v11 = vld [vmem:[%s6540_s1 + $0xb6c] ss:$16 sps:$4 sm:$0xff]   ;;  %v4846_v14 = vld [vmem:[%s6540_s1 + $0x968] ss:$16 sps:$4 sm:$0xff]  }
 0x139   :  { %2842 = vmatprep.subr.bf16.mxu1 %v4767_v15  ;;  %v4849_v15 = vld [vmem:[%s6540_s1 + $0xb68] ss:$16 sps:$4 sm:$0xff]  }
 0x13b   :  { %2800 = vmatpush2.bf16.msra.mxu0 %v4762_v16  ;;  %v4854_v16 = vld [vmem:[%s6540_s1 + $0x94c] ss:$16 sps:$4 sm:$0xff]  }
 0x13c   :  { %2843 = vmatpush2.bf16.msra.mxu1 %v4765_v17  ;;  %2801 = vmatprep.subr.bf16.mxu0 %v4770_v18  ;;  %v4857_v17 = vld [vmem:[%s6540_s1 + $0xb4c] ss:$16 sps:$4 sm:$0xff]   ;;  %v4852_v18 = vld [vmem:[%s6540_s1 + $0x948] ss:$16 sps:$4 sm:$0xff]  }
 0x13d   :  { %2844 = vmatprep.subr.bf16.mxu1 %v4773_v19  ;;  %v4855_v19 = vld [vmem:[%s6540_s1 + $0xb48] ss:$16 sps:$4 sm:$0xff]  }
 0x13f   :  { %2802 = vmatpush2.bf16.msra.mxu0 %v4768_v20  ;;  %v4860_v20 = vld [vmem:[%s6540_s1 + $0x92c] ss:$16 sps:$4 sm:$0xff]  }
 0x140   :  { %2845 = vmatpush2.bf16.msra.mxu1 %v4771_v21  ;;  %2857 = vmatprep.subr.bf16.mxu0 %v4776_v22  ;;  %v4863_v21 = vld [vmem:[%s6540_s1 + $0xb2c] ss:$16 sps:$4 sm:$0xff]   ;;  %v4858_v22 = vld [vmem:[%s6540_s1 + $0x928] ss:$16 sps:$4 sm:$0xff]  }
 0x141   :  { %2900 = vmatprep.subr.bf16.mxu1 %v4779_v23  ;;  %v4861_v23 = vld [vmem:[%s6540_s1 + $0xb28] ss:$16 sps:$4 sm:$0xff]  }
 0x142   :  { %2804 = vmatmul.mubr.bf16.vlgmr.msra.gmra.mxu0 %v6055_v28 }
 0x143   :  { %2847 = vmatmul.mubr.bf16.vlgmr.msra.gmra.mxu1 %v6061_v29  ;;  %2858 = vmatpush1.bf16.msra.mxu0 %v4774_v24  ;;  %v4866_v24 = vld [vmem:[%s6540_s1 + $0x90c] ss:$16 sps:$4 sm:$0xff]  }
 0x144   :  { %2901 = vmatpush1.bf16.msra.mxu1 %v4777_v25  ;;  %2859 = vmatprep.subr.bf16.mxu0 %v4782_v26  ;;  %v4869_v25 = vld [vmem:[%s6540_s1 + $0xb0c] ss:$16 sps:$4 sm:$0xff]   ;;  %v4864_v26 = vld [vmem:[%s6540_s1 + $0x908] ss:$16 sps:$4 sm:$0xff]  }
 0x145   :  { %2902 = vmatprep.subr.bf16.mxu1 %v4785_v27  ;;  %2889 = vmatprep.mubr.bf16.mxu0 %v4966_v34  ;;  %v4867_v27 = vld [vmem:[%s6540_s1 + $0xb08] ss:$16 sps:$4 sm:$0xff]  }
 0x146   :  { %2932 = vmatprep.mubr.bf16.mxu1 %v4967_v35 }
 0x147   :  { %2860 = vmatpush1.bf16.msra.mxu0 %v4780_v30  ;;  %v2461_v30 = vpop.f32.mrf.mxu0 }
 0x148   :  { %2903 = vmatpush1.bf16.msra.mxu1 %v4783_v31  ;;  %2861 = vmatprep.subr.bf16.mxu0 %v4788_v32  ;;  %v2504_v31 = vpop.f32.mrf.mxu1 }
 0x149   :  { %2904 = vmatprep.subr.bf16.mxu1 %v4791_v33  ;;  %v2463_v32 = vpop.f32.mrf.mxu0 }
 0x14a   :  { %v2506_v33 = vpop.f32.mrf.mxu1 }
 0x14b   :  { %2862 = vmatpush1.bf16.msra.mxu0 %v4786_v36  ;;  %v2465_v34 = vpop.f32.mrf.mxu0 }
 0x14c   :  { %2905 = vmatpush1.bf16.msra.mxu1 %v4789_v37  ;;  %2863 = vmatprep.subr.bf16.mxu0 %v4794_v38  ;;  %v2508_v35 = vpop.f32.mrf.mxu1 }
 0x14d   :  { %2906 = vmatprep.subr.bf16.mxu1 %v4797_v39  ;;  %v2467_v36 = vpop.f32.mrf.mxu0 }
 0x14e   :  { %v2510_v37 = vpop.f32.mrf.mxu1 }
 0x14f   :  { %2864 = vmatpush1.bf16.msra.mxu0 %v4792_v40  ;;  %v2547_v38 = vpop.f32.mrf.mxu0 }
 0x150   :  { %2907 = vmatpush1.bf16.msra.mxu1 %v4795_v41  ;;  %2865 = vmatprep.subr.bf16.mxu0 %v4800_v42  ;;  %v2590_v39 = vpop.f32.mrf.mxu1 }
 0x151   :  { %2908 = vmatprep.subr.bf16.mxu1 %v4803_v43  ;;  %v2549_v40 = vpop.f32.mrf.mxu0 }
 0x152   :  { %v2592_v41 = vpop.f32.mrf.mxu1 }
 0x153   :  { %2866 = vmatpush1.bf16.msra.mxu0 %v4798_v44  ;;  %v2551_v42 = vpop.f32.mrf.mxu0 }
 0x154   :  { %2909 = vmatpush1.bf16.msra.mxu1 %v4801_v45  ;;  %2867 = vmatprep.subr.bf16.mxu0 %v4806_v46  ;;  %v6246_v43 = vpop.f32.mrf.mxu1 }
 0x155   :  { %2910 = vmatprep.subr.bf16.mxu1 %v4809_v47  ;;  %v2553_v44 = vpop.f32.mrf.mxu0 }
 0x156   :  { %v6248_v45 = vpop.f32.mrf.mxu1 }
 0x157   :  { %2868 = vmatpush1.bf16.msra.mxu0 %v4804_v48 }
 0x158   :  { %2911 = vmatpush1.bf16.msra.mxu1 %v4807_v49  ;;  %2869 = vmatprep.subr.bf16.mxu0 %v4812_v50 }
 0x159   :  { %2912 = vmatprep.subr.bf16.mxu1 %v4815_v51 }
 0x15b   :  { %2870 = vmatpush1.bf16.msra.mxu0 %v4810_v52  ;;  %v427_v52 = vlaneseq }
 0x15c   :  { %2913 = vmatpush1.bf16.msra.mxu1 %v4813_v53  ;;  %2871 = vmatprep.subr.bf16.mxu0 %v4818_v54 }
 0x15d   :  { %2914 = vmatprep.subr.bf16.mxu1 %v4821_v55  ;;  %v428_v55 = vshrl.u32 %v427_v52, 7 }
 0x15f   :  { %2872 = vmatpush1.bf16.msra.mxu0 %v4816_v56 }
 0x160   :  { %2915 = vmatpush1.bf16.msra.mxu1 %v4819_v57  ;;  %2873 = vmatprep.subr.bf16.mxu0 %v4824_v58  ;;  %v429_v58 = vsub.s32 0, %v428_v55 }
 0x161   :  { %2916 = vmatprep.subr.bf16.mxu1 %v4827_v59  ;;  %v433_v59 = vsub.s32 1, %v428_v55 }
 0x163   :  { %2874 = vmatpush2.bf16.msra.mxu0 %v4822_v60 }
 0x164   :  { %2917 = vmatpush2.bf16.msra.mxu1 %v4825_v61  ;;  %2875 = vmatprep.subr.bf16.mxu0 %v4830_v62  ;;  %v425_v62 = vld [vmem:[%s6542_s2] sm:$0xf] }
 0x165   :  { %2918 = vmatprep.subr.bf16.mxu1 %v4833_v63  ;;  %v437_v63 = vsub.s32 2, %v428_v55 }
 0x167   :  { %2876 = vmatpush2.bf16.msra.mxu0 %v4828_v0  ;;  %v441_v0 = vsub.s32 3, %v428_v55 }
 0x168   :  { %2919 = vmatpush2.bf16.msra.mxu1 %v4831_v1  ;;  %2877 = vmatprep.subr.bf16.mxu0 %v4836_v2  ;;  %v430_v1 = vrot.slane %v425_v62, %v429_v58  ;;  %v434_v2 = vrot.slane %v425_v62, %v433_v59 }
 0x169   :  { %2920 = vmatprep.subr.bf16.mxu1 %v4839_v3 }
 0x16b   :  { %2878 = vmatpush2.bf16.msra.mxu0 %v4834_v4 }
 0x16c   :  { %2921 = vmatpush2.bf16.msra.mxu1 %v4837_v5  ;;  %2879 = vmatprep.subr.bf16.mxu0 %v4842_v6  ;;  %v438_v5 = vrot.slane %v425_v62, %v437_v63 }
 0x16d   :  { %2922 = vmatprep.subr.bf16.mxu1 %v4845_v7 }
 0x16f   :  { %2880 = vmatpush2.bf16.msra.mxu0 %v4840_v8  ;;  %v442_v8 = vrot.slane %v425_v62, %v441_v0 }
 0x170   :  { %2923 = vmatpush2.bf16.msra.mxu1 %v4843_v9  ;;  %2881 = vmatprep.subr.bf16.mxu0 %v4848_v10  ;;  %v2462_v9 = vadd.f32 %v2461_v30, %v430_v1  ;;  %v2464_v10 = vadd.f32 %v2463_v32, %v434_v2 }
 0x171   :  { %2924 = vmatprep.subr.bf16.mxu1 %v4851_v11 }
 0x173   :  { %2882 = vmatpush2.bf16.msra.mxu0 %v4846_v14 }
 0x174   :  { %2925 = vmatpush2.bf16.msra.mxu1 %v4849_v15  ;;  %2883 = vmatprep.subr.bf16.mxu0 %v4854_v16 }
 0x175   :  { %2926 = vmatprep.subr.bf16.mxu1 %v4857_v17  ;;  %v2505_v17 = vadd.f32 %v2504_v31, %v2462_v9 }
 0x177   :  { %2884 = vmatpush2.bf16.msra.mxu0 %v4852_v18  ;;  %v2507_v18 = vadd.f32 %v2506_v33, %v2464_v10 }
 0x178   :  { %2927 = vmatpush2.bf16.msra.mxu1 %v4855_v19  ;;  %2885 = vmatprep.subr.bf16.mxu0 %v4860_v20  ;;  %v2466_v19 = vadd.f32 %v2465_v34, %v430_v1  ;;  %v2468_v20 = vadd.f32 %v2467_v36, %v434_v2 }
 0x179   :  { %2928 = vmatprep.subr.bf16.mxu1 %v4863_v21 }
 0x17a   :  { %v2509_v58 = vadd.f32 %v2508_v35, %v2466_v19  ;;  %v2511_v30 = vadd.f32 %v2510_v37, %v2468_v20  ;;  %v4871_v20 = vld [vmem:[%s6543_s3 + $0x1f8] sm:$0xff]  }
 0x17b   :  { %2886 = vmatpush2.bf16.msra.mxu0 %v4858_v22 }
 0x17c   :  { %2929 = vmatpush2.bf16.msra.mxu1 %v4861_v23  ;;  %2887 = vmatprep.subr.bf16.mxu0 %v4866_v24  ;;  %v2548_v23 = vadd.f32 %v2547_v38, %v2505_v17  ;;  %v2550_v24 = vadd.f32 %v2549_v40, %v2507_v18  ;;  %v2554_v34 = vadd.f32 %v2553_v44, %v2511_v30 }
 0x17d   :  { %2930 = vmatprep.subr.bf16.mxu1 %v4869_v25 }
 0x17e   :  { %v2591_v59 = vadd.f32 %v2590_v39, %v2548_v23  ;;  %v2593_v62 = vadd.f32 %v2592_v41, %v2550_v24  ;;  %v2597_v39 = vadd.f32 %v6248_v45, %v2554_v34  ;;  %v4876_v23 = vld [vmem:[%s6543_s3 + $0x130] sm:$0xff]  }
 0x17f   :  { %2888 = vmatpush2.bf16.msra.mxu0 %v4864_v26  ;;  %v4877_v24 = vld [vmem:[%s6543_s3 + $0x1b0] sm:$0xff]  }
 0x180   :  { %2931 = vmatpush2.bf16.msra.mxu1 %v4867_v27 }
 0x181   :  { %4210 = vmatprep.subr.bf16.mxu1 %v4871_v20  ;;  %v4901_v20 = vld [vmem:[%s6543_s3 + $0x180] sm:$0xff]  }
 0x182   :  { %2890 = vmatmul.mubr.bf16.vlgmr.msra.gmra.mxu0 %v5629_v12  ;;  %v2633_v12 = vpop.f32.mrf.mxu0 }
 0x183   :  { %2933 = vmatmul.mubr.bf16.vlgmr.msra.gmra.mxu1 %v5634_v13  ;;  %v6250_v13 = vpop.f32.mrf.mxu1  ;;  %v2634_v38 = vadd.f32 %v2633_v12, %v2591_v59 }
 0x184   :  { %v2635_v46 = vpop.f32.mrf.mxu0 }
 0x185   :  { %v6252_v47 = vpop.f32.mrf.mxu1  ;;  %v2636_v40 = vadd.f32 %v2635_v46, %v2593_v62  ;;  %v2677_v44 = vadd.f32 %v6250_v13, %v2634_v38 }
 0x186   :  { %v6254_v48 = vpop.f32.mrf.mxu0 }
 0x187   :  { %v6256_v49 = vpop.f32.mrf.mxu1 }
 0x188   :  { %v6258_v50 = vpop.f32.mrf.mxu0 }
 0x189   :  { %v6260_v51 = vpop.f32.mrf.mxu1 }
 0x1c2   :  { %v2719_v53 = vpop.f32.mrf.mxu0 }
 0x1c3   :  { %v2762_v54 = vpop.f32.mrf.mxu1  ;;  %v2720_v11 = vadd.f32 %v2719_v53, %v438_v5 }
 0x1c4   :  { %v2721_v56 = vpop.f32.mrf.mxu0 }
 0x1c5   :  { %v2764_v57 = vpop.f32.mrf.mxu1  ;;  %v2722_v16 = vadd.f32 %v2721_v56, %v442_v8  ;;  %v2763_v21 = vadd.f32 %v2762_v54, %v2720_v11  ;;  %v2552_v56 = vadd.f32 %v2551_v42, %v2509_v58 }
 0x1c6   :  { %v2723_v60 = vpop.f32.mrf.mxu0 }
 0x1c7   :  { %v2766_v61 = vpop.f32.mrf.mxu1  ;;  %v2724_v22 = vadd.f32 %v2723_v60, %v438_v5  ;;  %v2765_v27 = vadd.f32 %v2764_v57, %v2722_v16  ;;  %v2595_v35 = vadd.f32 %v6246_v43, %v2552_v56 }
 0x1c8   :  { %v2725_v3 = vpop.f32.mrf.mxu0 }
 0x1c9   :  { %v2768_v4 = vpop.f32.mrf.mxu1  ;;  %v2726_v52 = vadd.f32 %v2725_v3, %v442_v8  ;;  %v2767_v32 = vadd.f32 %v2766_v61, %v2724_v22  ;;  %v2638_v12 = vadd.f32 %v6254_v48, %v2595_v35  ;;  %v4875_v22 = vld [vmem:[%s6543_s3 + $0x1f0] sm:$0xff]  }
 0x1cb   :  { %v2769_v36 = vadd.f32 %v2768_v4, %v2726_v52  ;;  %v2679_v4 = vadd.f32 %v6252_v47, %v2636_v40  ;;  %v2681_v16 = vadd.f32 %v6256_v49, %v2638_v12  ;;  %v4872_v49 = vld [vmem:[%s6543_s3 + $0x138] sm:$0xff]   ;;  %v4880_v12 = vld [vmem:[%s6543_s3 + $0x128] sm:$0xff]  }
 0x202   :  { %v2805_v6 = vpop.f32.mrf.mxu0 }
 0x203   :  { %v2848_v7 = vpop.f32.mrf.mxu1  ;;  %v2806_v55 = vadd.f32 %v2805_v6, %v2763_v21  ;;  %v2640_v6 = vadd.f32 %v6258_v50, %v2597_v39  ;;  %v4870_v50 = vld [vmem:[%s6543_s3 + $0x178] sm:$0xff]   ;;  %v4874_v21 = vld [vmem:[%s6543_s3 + $0x170] sm:$0xff]  }
 0x204   :  { %v2807_v14 = vpop.f32.mrf.mxu0  ;;  %4188 = vmatprep.subr.bf16.mxu0 %v4870_v50  ;;  %v4900_v50 = vld [vmem:[%s6543_s3 + $0x100] sm:$0xff]  }
 0x205   :  { %v2850_v15 = vpop.f32.mrf.mxu1  ;;  %v2808_v53 = vadd.f32 %v2807_v14, %v2765_v27  ;;  %v2849_v54 = vadd.f32 %v2848_v7, %v2806_v55  ;;  %v2683_v13 = vadd.f32 %v6260_v51, %v2640_v6  ;;  %v4873_v51 = vld [vmem:[%s6543_s3 + $0x1b8] sm:$0xff]   ;;  %4189 = vmatpush3.bf16.msra.mxu0 %v4872_v49  ;;  %v4883_v6 = vld [vmem:[%s6543_s3 + $0x1e0] sm:$0xff]  }
 0x206   :  { %v2809_v25 = vpop.f32.mrf.mxu0  ;;  %4211 = vmatpush3.bf16.msra.mxu1 %v4873_v51  ;;  %4190 = vmatprep.subr.bf16.mxu0 %v4874_v21  ;;  %v4902_v49 = vld [vmem:[%s6543_s3 + $0x78] sm:$0xff]  }
 0x207   :  { %v2852_v26 = vpop.f32.mrf.mxu1  ;;  %v2810_v60 = vadd.f32 %v2809_v25, %v2767_v32  ;;  %v2851_v57 = vadd.f32 %v2850_v15, %v2808_v53  ;;  %4212 = vmatprep.subr.bf16.mxu1 %v4875_v22  ;;  %v4903_v51 = vld [vmem:[%s6543_s3 + $0xf8] sm:$0xff]  }
 0x208   :  { %v2811_v31 = vpop.f32.mrf.mxu0 }
 0x209   :  { %v2854_v33 = vpop.f32.mrf.mxu1  ;;  %v2812_v1 = vadd.f32 %v2811_v31, %v2769_v36  ;;  %v2853_v41 = vadd.f32 %v2852_v26, %v2810_v60  ;;  %4191 = vmatpush3.bf16.msra.mxu0 %v4876_v23 }
 0x20a   :  { %4213 = vmatpush3.bf16.msra.mxu1 %v4877_v24 }
 0x20b   :  { %v2855_v7 = vadd.f32 %v2854_v33, %v2812_v1 }
 0x242   :  { %v2891_v63 = vpop.f32.mrf.mxu0 }
 0x243   :  { %v2934_v0 = vpop.f32.mrf.mxu1  ;;  %v2892_v2 = vadd.f32 %v2891_v63, %v2849_v54 }
 0x244   :  { %v2893_v37 = vpop.f32.mrf.mxu0 }
 0x245   :  { %v2936_v61 = vpop.f32.mrf.mxu1  ;;  %v2935_v42 = vadd.f32 %v2934_v0, %v2892_v2  ;;  %v2894_v3 = vadd.f32 %v2893_v37, %v2851_v57 }
 0x246   :  { %v2895_v46 = vpop.f32.mrf.mxu0 }
 0x247   :  { %v2938_v5 = vpop.f32.mrf.mxu1  ;;  %v2937_v8 = vadd.f32 %v2936_v61, %v2894_v3  ;;  %v2896_v43 = vadd.f32 %v2895_v46, %v2853_v41  ;;  %v2943_v45 = vmax.f32 %v2677_v44, %v2935_v42  ;;  %v4881_v46 = vld [vmem:[%s6543_s3 + $0x1a8] sm:$0xff]  }
 0x248   :  { %v2897_v9 = vpop.f32.mrf.mxu0 }
 0x249   :  { %v2939_v10 = vadd.f32 %v2938_v5, %v2896_v43  ;;  %v2898_v11 = vadd.f32 %v2897_v9, %v2855_v7  ;;  %v2944_v14 = vmax.f32 %v2679_v4, %v2937_v8  ;;  %v2940_v15 = vpop.f32.mrf.mxu1  ;;  %v4882_v5 = vld [vmem:[%s6543_s3 + $0x160] sm:$0xff]   ;;  %v4886_v43 = vld [vmem:[%s6543_s3 + $0x158] sm:$0xff]  }
 0x24a   :  { %v4884_v7 = vld [vmem:[%s6543_s3 + $0x120] sm:$0xff]   ;;  %v4887_v9 = vld [vmem:[%s6543_s3 + $0x1d8] sm:$0xff]  }
 0x24b   :  { %v2941_v47 = vadd.f32 %v2940_v15, %v2898_v11  ;;  %v2945_v17 = vmax.f32 %v2943_v45, %v2944_v14  ;;  %v2948_v48 = vmax.f32 %v2681_v16, %v2939_v10  ;;  %v4889_v11 = vld [vmem:[%s6543_s3 + $0x198] sm:$0xff]   ;;  %v4890_v45 = vld [vmem:[%s6543_s3 + $0x150] sm:$0xff]  }
 0x24c   :  { %v4891_v14 = vld [vmem:[%s6543_s3 + $0x1d0] sm:$0xff]  }
 0x24d   :  { %v2949_v18 = vmax.f32 %v2683_v13, %v2941_v47  ;;  %2946 = vmax.xlane.f32.xlu0 %v2945_v17  ;;  %v4892_v15 = vld [vmem:[%s6543_s3 + $0x110] sm:$0xff]   ;;  %v4896_v17 = vld [vmem:[%s6543_s3 + $0x108] sm:$0xff]  }
 0x24f   :  { %v2950_v19 = vmax.f32 %v2948_v48, %v2949_v18  ;;  %v4897_v48 = vld [vmem:[%s6543_s3 + $0x188] sm:$0xff]   ;;  %v4898_v18 = vld [vmem:[%s6543_s3 + $0x140] sm:$0xff]  }
 0x251   :  { %2951 = vmax.xlane.f32.xlu0 %v2950_v19  ;;  %v4899_v19 = vld [vmem:[%s6543_s3 + $0x1c0] sm:$0xff]  }
 0x2d6   :  { %v2947_v25 = vpop.xlane.xlu0 %2946 }
 0x2d7   :  { %v2953_v26 = vsub.f32 %v2677_v44, %v2947_v25  ;;  %v2954_v27 = vsub.f32 %v2679_v4, %v2947_v25  ;;  %v2955_v52 = vsub.f32 %v2935_v42, %v2947_v25  ;;  %v2956_v55 = vsub.f32 %v2937_v8, %v2947_v25  ;;  %v4878_v44 = vld [vmem:[%s6543_s3 + $0x168] sm:$0xff]   ;;  %v4885_v8 = vld [vmem:[%s6543_s3 + $0x1a0] sm:$0xff]  }
 0x2d8   :  { %v4879_v4 = vld [vmem:[%s6543_s3 + $0x1e8] sm:$0xff]   ;;  %4192 = vmatprep.subr.bf16.mxu0 %v4878_v44  ;;  %v4916_v44 = vld [vmem:[%s6543_s3 + $0x20] sm:$0xff]  }
 0x2d9   :  { %v2961_v58 = vmul.f32 1.442695, %v2953_v26  ;;  %v2963_v30 = vmul.f32 1.442695, %v2954_v27  ;;  %v2965_v32 = vmul.f32 1.442695, %v2955_v52  ;;  %4214 = vmatprep.subr.bf16.mxu1 %v4879_v4  ;;  %4193 = vmatpush3.bf16.msra.mxu0 %v4880_v12 }
 0x2da   :  { %v2967_v53 = vmul.f32 1.442695, %v2956_v55  ;;  %v2952_v59 = vpop.xlane.xlu0 %2951  ;;  %4215 = vmatpush3.bf16.msra.mxu1 %v4881_v46  ;;  %4194 = vmatprep.subr.bf16.mxu0 %v4882_v5  ;;  %v4917_v4 = vld [vmem:[%s6543_s3 + $0xa0] sm:$0xff]   ;;  %v4918_v12 = vld [vmem:[%s6543_s3 + $0x58] sm:$0xff]  }
 0x2db   :  { %4934 = vpow2.f32 %v2961_v58  ;;  %v2957_v62 = vsub.f32 %v2681_v16, %v2952_v59  ;;  %v2958_v56 = vsub.f32 %v2683_v13, %v2952_v59  ;;  %v2959_v31 = vsub.f32 %v2939_v10, %v2952_v59  ;;  %4216 = vmatprep.subr.bf16.mxu1 %v4883_v6  ;;  %v4888_v10 = vld [vmem:[%s6543_s3 + $0x118] sm:$0xff]   ;;  %v4893_v16 = vld [vmem:[%s6543_s3 + $0x190] sm:$0xff]   ;;  %v4894_v13 = vld [vmem:[%s6543_s3 + $0x148] sm:$0xff]  }
 0x2dc   :  { %4936 = vpow2.f32 %v2963_v30  ;;  %v2960_v33 = vsub.f32 %v2941_v47, %v2952_v59  ;;  %v4895_v47 = vld [vmem:[%s6543_s3 + $0x1c8] sm:$0xff]   ;;  %v4919_v46 = vld [vmem:[%s6543_s3 + $0xd8] sm:$0xff]  }
 0x2dd   :  { %4938 = vpow2.f32 %v2965_v32  ;;  %v2969_v34 = vmul.f32 1.442695, %v2957_v62  ;;  %v2971_v36 = vmul.f32 1.442695, %v2958_v56  ;;  %v2973_v54 = vmul.f32 1.442695, %v2959_v31  ;;  %4195 = vmatpush3.bf16.msra.mxu0 %v4884_v7 }
 0x2de   :  { %4940 = vpow2.f32 %v2967_v53  ;;  %v2975_v60 = vmul.f32 1.442695, %v2960_v33  ;;  %4217 = vmatpush3.bf16.msra.mxu1 %v4885_v8  ;;  %4196 = vmatprep.subr.bf16.mxu0 %v4886_v43  ;;  %v4968_v31 = vld [vmem:[%s6541_s0 + $0x14] ss:$48 sps:$4 sm:$0xff]   ;;  %v4920_v5 = vld [vmem:[%s6543_s3 + $0x18] sm:$0xff]  }
 0x2df   :  { %4942 = vpow2.f32 %v2969_v34  ;;  %4218 = vmatprep.subr.bf16.mxu1 %v4887_v9  ;;  %v4969_v34 = vld [vmem:[%s6541_s0 + $0x1c] ss:$48 sps:$4 sm:$0xff]   ;;  %v4922_v7 = vld [vmem:[%s6543_s3 + $0x50] sm:$0xff]  }
 0x2e0   :  { %4944 = vpow2.f32 %v2971_v36  ;;  %v4921_v6 = vld [vmem:[%s6543_s3 + $0x98] sm:$0xff]   ;;  %v4923_v8 = vld [vmem:[%s6543_s3 + $0xd0] sm:$0xff]  }
 0x2e1   :  { %4946 = vpow2.f32 %v2973_v54  ;;  %4197 = vmatpush3.bf16.msra.mxu0 %v4888_v10  ;;  %v4924_v43 = vld [vmem:[%s6543_s3 + $0x10] sm:$0xff]   ;;  %v4926_v10 = vld [vmem:[%s6543_s3 + $0x48] sm:$0xff]  }
 0x2e2   :  { %4948 = vpow2.f32 %v2975_v60  ;;  %4219 = vmatpush3.bf16.msra.mxu1 %v4889_v11  ;;  %4198 = vmatprep.subr.bf16.mxu0 %v4890_v45  ;;  %v4925_v9 = vld [vmem:[%s6543_s3 + $0x90] sm:$0xff]   ;;  %v4927_v11 = vld [vmem:[%s6543_s3 + $0xc8] sm:$0xff]  }
 0x2e3   :  { %4220 = vmatprep.subr.bf16.mxu1 %v4891_v14  ;;  %v4928_v45 = vld [vmem:[%s6543_s3 + $0x8] sm:$0xff]  }
 0x2e4   :  { %v4929_v14 = vld [vmem:[%s6543_s3 + $0x88] sm:$0xff]  }
 0x2e5   :  { %4199 = vmatpush3.bf16.msra.mxu0 %v4892_v15  ;;  %v4930_v15 = vld [vmem:[%s6543_s3 + $0x40] sm:$0xff]  }
 0x2e6   :  { %4221 = vmatpush3.bf16.msra.mxu1 %v4893_v16  ;;  %4200 = vmatprep.subr.bf16.mxu0 %v4894_v13  ;;  %v4931_v16 = vld [vmem:[%s6543_s3 + $0xc0] sm:$0xff]  }
 0x2e7   :  { %4222 = vmatprep.subr.bf16.mxu1 %v4895_v47  ;;  %v4932_v13 = vld [vmem:[%s6543_s3] sm:$0xff]  }
 0x2e8   :  { %v6297_v38 = vpop.eup %4934  ;;  %v4933_v47 = vld [vmem:[%s6543_s3 + $0x80] sm:$0xff]  }
 0x2e9   :  { %v6299_v40 = vpop.eup %4936  ;;  %4201 = vmatpush3.bf16.msra.mxu0 %v4896_v17  ;;  %v4972_v17 = vld [vmem:[%s6541_s0] ss:$48 sps:$4 sm:$0xff]  }
 0x2ea   :  { %v6301_v63 = vpop.eup %4938  ;;  %v2977_v0 = vadd.f32 %v6299_v40, %v6297_v38  ;;  %4223 = vmatpush3.bf16.msra.mxu1 %v4897_v48  ;;  %4202 = vmatprep.subr.bf16.mxu0 %v4898_v18  ;;  %v4973_v18 = vld [vmem:[%s6541_s0 + $0x8] ss:$48 sps:$4 sm:$0xff]  }
 0x2eb   :  { %v6305_v57 = vpop.eup %4940  ;;  %4224 = vmatprep.subr.bf16.mxu1 %v4899_v19 }
 0x2ec   :  { %v6307_v1 = vpop.eup %4942  ;;  %v2978_v2 = vadd.f32 %v6301_v63, %v2977_v0 }
 0x2ed   :  { %v6310_v35 = vpop.eup %4944  ;;  %4203 = vmatpush3.bf16.msra.mxu0 %v4900_v50  ;;  %v12_v50 = vstv %s6544_s6 }
 0x2ee   :  { %v2979_v37 = vadd.f32 %v6305_v57, %v2978_v2  ;;  %v2982_v61 = vadd.f32 %v6310_v35, %v6307_v1  ;;  %v6315_v39 = vpop.eup %4946  ;;  %4225 = vmatpush3.bf16.msra.mxu1 %v4901_v20  ;;  %4232 = vmatprep.subr.bf16.mxu0 %v4902_v49  ;;  %v4908_v2 = vld [vmem:[%s6543_s3 + $0x30] sm:$0xff]   ;;  %13 = vst [vmem:[#allocation2] sm:$0x1] %v12_v50 }
 0x2ef   :  { %v6318_v42 = vpop.eup %4948  ;;  %4254 = vmatprep.subr.bf16.mxu1 %v4903_v51 }
 0x2f0   :  { %2980 = vadd.xlane.f32.xlu1 %v2979_v37  ;;  %v2983_v41 = vadd.f32 %v6315_v39, %v2982_v61  ;;  %v4910_v37 = vld [vmem:[%s6543_s3 + $0x68] sm:$0xff]  }
 0x2f1   :  { %v4911_v61 = vld [vmem:[%s6543_s3 + $0xe8] sm:$0xff]  }
 0x2f2   :  { %v2984_v3 = vadd.f32 %v6318_v42, %v2983_v41  ;;  %v4913_v41 = vld [vmem:[%s6543_s3 + $0xa8] sm:$0xff]  }
 0x2f4   :  { %2985 = vadd.xlane.f32.xlu1 %v2984_v3  ;;  %v4915_v3 = vld [vmem:[%s6543_s3 + $0xe0] sm:$0xff]  }
 0x379   :  { %v2981_v21 = vpop.xlane.xlu1 %2980 }
 0x37a   :  { %4950 = vrcp.f32 %v2981_v21 }
 0x37d   :  { %v2986_v22 = vpop.xlane.xlu1 %2985 }
 0x37e   :  { %4952 = vrcp.f32 %v2986_v22 }
 0x387   :  { %v4951_v23 = vpop.eup %4950 }
 0x388   :  { %v2990_v25 = vmul.f32 %v4951_v23, %v6299_v40  ;;  %v2992_v26 = vmul.f32 %v4951_v23, %v6305_v57  ;;  %v2989_v27 = vmul.f32 %v4951_v23, %v6297_v38  ;;  %v2991_v52 = vmul.f32 %v4951_v23, %v6301_v63  ;;  %v4904_v38 = vld [vmem:[%s6543_s3 + $0x38] sm:$0xff]   ;;  %v4906_v63 = vld [vmem:[%s6543_s3 + $0x70] sm:$0xff]  }
 0x389   :  { %v4905_v40 = vld [vmem:[%s6543_s3 + $0xb8] sm:$0xff]  }
 0x38a   :  { %v4971_v57 = vld [vmem:[%s6541_s0 + $0xc] ss:$48 sps:$4 sm:$0xff]  }
 0x38b   :  { %v4953_v24 = vpop.eup %4952 }
 0x38c   :  { %v2994_v55 = vmul.f32 %v4953_v24, %v6310_v35  ;;  %v2996_v58 = vmul.f32 %v4953_v24, %v6318_v42  ;;  %v2993_v30 = vmul.f32 %v4953_v24, %v6307_v1  ;;  %v2995_v32 = vmul.f32 %v4953_v24, %v6315_v39  ;;  %v4909_v35 = vld [vmem:[%s6543_s3 + $0xb0] sm:$0xff]   ;;  %v4912_v39 = vld [vmem:[%s6543_s3 + $0x28] sm:$0xff]   ;;  %v4914_v42 = vld [vmem:[%s6543_s3 + $0x60] sm:$0xff]  }
 0x38e   :  { %v2998_v53 = vpack.c.bf16 %v2994_v55, %v2990_v25  ;;  %v3000_v59 = vpack.c.bf16 %v2996_v58, %v2992_v26  ;;  %v6407_v62 = vpack.c.bf16 %v2993_v30, %v2989_v27  ;;  %v6409_v56 = vpack.c.bf16 %v2995_v32, %v2991_v52 }
 0x390   :  { %v3070_v33 = vmul.bf16 %v4968_v31, %v2998_v53  ;;  %v3072_v36 = vmul.bf16 %v4969_v34, %v3000_v59  ;;  %v3069_v54 = vmul.bf16 %v6055_v28, %v6407_v62  ;;  %v3071_v60 = vmul.bf16 %v6061_v29, %v6409_v56  ;;  %v4907_v28 = vld [vmem:[%s6543_s3 + $0xf0] sm:$0xff]  }
 0x391   :  { %v4970_v29 = vld [vmem:[%s6541_s0 + $0x4] ss:$48 sps:$4 sm:$0xff]   ;;  %v3004_v1 = vmul.bf16 %v4971_v57, %v3000_v59  ;;  %v3001_v48 = vmul.bf16 %v4972_v17, %v6407_v62  ;;  %v3003_v19 = vmul.bf16 %v4973_v18, %v6409_v56 }
 0x392   :  { %3361 = vmatprep.mubr.bf16.mxu0 %v3070_v33  ;;  %3402 = vmatprep.mubr.bf16.mxu1 %v3072_v36  ;;  %v3002_v0 = vmul.bf16 %v4970_v29, %v2998_v53  ;;  %v4185_v36 = vld [vmem:[%s6545_s4] ss:$0 sm:$0xff] }
 0x393   :  { %3362 = vmatmul.mubr.bf16.vlgmr.msra.gmra.mxu0 %v3069_v54  ;;  %3403 = vmatmul.mubr.bf16.vlgmr.msra.gmra.mxu1 %v3071_v60 }
 0x394   :  { %4233 = vmatpush3.bf16.msra.mxu0 %v4904_v38  ;;  %4255 = vmatpush3.bf16.msra.mxu1 %v4905_v40 }
 0x395   :  { %3635 = vmatprep.mubr.bf16.mxu0 %v3002_v0  ;;  %3676 = vmatprep.mubr.bf16.mxu1 %v3004_v1 }
 0x396   :  { %4234 = vmatprep.subr.bf16.mxu0 %v4906_v63  ;;  %4256 = vmatprep.subr.bf16.mxu1 %v4907_v28 }
 0x398   :  { %4235 = vmatpush3.bf16.msra.mxu0 %v4908_v2  ;;  %4257 = vmatpush3.bf16.msra.mxu1 %v4909_v35  ;;  %v4186_v2 = vld [vmem:[%s6546_s5] ss:$0 sm:$0xff] }
 0x399   :  { %4236 = vmatprep.subr.bf16.mxu0 %v4910_v37  ;;  %4258 = vmatprep.subr.bf16.mxu1 %v4911_v61 }
 0x39c   :  { %4237 = vmatpush3.bf16.msra.mxu0 %v4912_v39  ;;  %4259 = vmatpush3.bf16.msra.mxu1 %v4913_v41  ;;  %v4187_v41 = vld [vmem:[#allocation2] ss:$0 sm:$0xff] }
 0x39d   :  { %4238 = vmatprep.subr.bf16.mxu0 %v4914_v42  ;;  %4260 = vmatprep.subr.bf16.mxu1 %v4915_v3 }
 0x3a0   :  { %4239 = vmatpush3.bf16.msra.mxu0 %v4916_v44  ;;  %4261 = vmatpush3.bf16.msra.mxu1 %v4917_v4 }
 0x3a1   :  { %4240 = vmatprep.subr.bf16.mxu0 %v4918_v12  ;;  %4262 = vmatprep.subr.bf16.mxu1 %v4919_v46 }
 0x3a4   :  { %4241 = vmatpush3.bf16.msra.mxu0 %v4920_v5  ;;  %4263 = vmatpush3.bf16.msra.mxu1 %v4921_v6 }
 0x3a5   :  { %4242 = vmatprep.subr.bf16.mxu0 %v4922_v7  ;;  %4264 = vmatprep.subr.bf16.mxu1 %v4923_v8 }
 0x3a8   :  { %4243 = vmatpush3.bf16.msra.mxu0 %v4924_v43  ;;  %4265 = vmatpush3.bf16.msra.mxu1 %v4925_v9 }
 0x3a9   :  { %4244 = vmatprep.subr.bf16.mxu0 %v4926_v10  ;;  %4266 = vmatprep.subr.bf16.mxu1 %v4927_v11 }
 0x3ac   :  { %4245 = vmatpush3.bf16.msra.mxu0 %v4928_v45  ;;  %4267 = vmatpush3.bf16.msra.mxu1 %v4929_v14 }
 0x3ad   :  { %4246 = vmatprep.subr.bf16.mxu0 %v4930_v15  ;;  %4268 = vmatprep.subr.bf16.mxu1 %v4931_v16 }
 0x3b0   :  { %4247 = vmatpush3.bf16.msra.mxu0 %v4932_v13  ;;  %4269 = vmatpush3.bf16.msra.mxu1 %v4933_v47 }
 0x3b3   :  { %3636 = vmatmul.mubr.bf16.vlgmr.msra.gmra.mxu0 %v3001_v48  ;;  %3677 = vmatmul.mubr.bf16.vlgmr.msra.gmra.mxu1 %v3003_v19 }
 0x453   :  { %v4204_v20 = vpop.f32.mrf.mxu0  ;;  %v4226_v49 = vpop.f32.mrf.mxu1 }
 0x455   :  { %v4205_v51 = vpop.f32.mrf.mxu0  ;;  %v4227_v21 = vpop.f32.mrf.mxu1 }
 0x456   :  { %v4206_v26 = vadd.f32 %v4205_v51, %v4204_v20  ;;  %v4228_v27 = vadd.f32 %v4227_v21, %v4226_v49 }
 0x457   :  { %v4207_v22 = vpop.f32.mrf.mxu0  ;;  %v4229_v23 = vpop.f32.mrf.mxu1 }
 0x458   :  { %v3405_v32 = vadd.f32 %v4228_v27, %v4206_v26 }
 0x459   :  { %v4208_v24 = vpop.f32.mrf.mxu0  ;;  %v4230_v25 = vpop.f32.mrf.mxu1 }
 0x45a   :  { %v4209_v53 = vadd.f32 %v4208_v24, %v4207_v22  ;;  %v4231_v59 = vadd.f32 %v4230_v25, %v4229_v23 }
 0x45c   :  { %v3408_v38 = vadd.f32 %v4231_v59, %v4209_v53 }
 0x473   :  { %v4248_v52 = vpop.f32.mrf.mxu0  ;;  %v4270_v55 = vpop.f32.mrf.mxu1 }
 0x475   :  { %v4249_v58 = vpop.f32.mrf.mxu0  ;;  %v4271_v30 = vpop.f32.mrf.mxu1 }
 0x476   :  { %v4250_v62 = vadd.f32 %v4249_v58, %v4248_v52  ;;  %v4272_v34 = vadd.f32 %v4271_v30, %v4270_v55 }
 0x477   :  { %v4251_v56 = vpop.f32.mrf.mxu0  ;;  %v4273_v31 = vpop.f32.mrf.mxu1 }
 0x478   :  { %v3638_v33 = vadd.f32 %v4250_v62, %v3405_v32 }
 0x479   :  { %v4252_v54 = vpop.f32.mrf.mxu0  ;;  %v4274_v60 = vpop.f32.mrf.mxu1 }
 0x47a   :  { %v3679_v40 = vadd.f32 %v4272_v34, %v3638_v33  ;;  %v4253_v63 = vadd.f32 %v4252_v54, %v4251_v56  ;;  %v4275_v0 = vadd.f32 %v4274_v60, %v4273_v31 }
 0x47c   :  { %v3692_v28 = vadd.f32 %v4185_v36, %v3679_v40  ;;  %v3641_v29 = vadd.f32 %v4253_v63, %v3408_v38 }
 0x47e   :  { %4954 = vtanh.f32 %v3692_v28  ;;  %v3682_v57 = vadd.f32 %v4275_v0, %v3641_v29 }
 0x480   :  { %v3693_v1 = vadd.f32 %v4185_v36, %v3682_v57 }
 0x482   :  { %4956 = vtanh.f32 %v3693_v1 }
 0x48b   :  { %v4955_v35 = vpop.eup %4954 }
 0x48c   :  { %v3703_v37 = vmul.f32 %v4955_v35, %v4186_v2 }
 0x48e   :  { %3705 = vadd.xlane.f32.xlu0 %v3703_v37 }
 0x48f   :  { %v4957_v61 = vpop.eup %4956 }
 0x490   :  { %v3704_v39 = vmul.f32 %v4957_v61, %v4186_v2 }
 0x492   :  { %3707 = vadd.xlane.f32.xlu1 %v3704_v39 }
 0x517   :  { %v3706_v42 = vpop.xlane.xlu0 %3705 }
 0x518   :  { %v3716_v3 = vadd.f32 %v4187_v41, %v3706_v42 }
 0x51a   :  { %3719 = vst.msk [vmem:[%s6547_s7] sm:$0xff] %vm3718_vm0, %v3716_v3 }
 0x51b   :  { %v3708_v44 = vpop.xlane.xlu1 %3707 }
 0x51c   :  { %v3717_v4 = vadd.f32 %v4187_v41, %v3708_v44 }
 0x51e   :  { %3720 = vst.msk [vmem:[%s6547_s7 + $0x8] sm:$0xff] %vm3718_vm0, %v3717_v4 }

</bundles_post_ra>
